<compile_context>
chip_gen: v5e
topology: v5e:2x2
jax: 0.10.0
libtpu: 0.0.40
codegen_flags: <defaults>
</compile_context>

<pallas_src>
import functools

import jax
import jax.numpy as jnp
import numpy as np
from jax.experimental import pallas as pl
from jax.experimental.pallas import tpu as pltpu


# ------------------------------ Pallas kernel --------------------------------

def _subblock_kernel(x_ref, wdw_ref, wpw_ref, bpw_ref, o_ref, *, K, dil, L_out):
    """Fused depthwise conv + pointwise conv (BN & dw-bias pre-folded) + ReLU.

    x_ref:   (B_tile, C_in, L_in)   batch tile (channels->sublanes, L->lanes)
    wdw_ref: (C_in, K)              depthwise taps
    wpw_ref: (C_out, C_in)          pointwise weight, BN scale folded in
    bpw_ref: (C_out, 1)             pointwise bias, BN shift + depthwise bias folded in
    o_ref:   (B_tile, C_out, L_out)
    """
    B_tile = x_ref.shape[0]
    C_in = x_ref.shape[1]

    wpw = wpw_ref[...]                                      # (C_out, C_in)
    bpw = bpw_ref[...]                                      # (C_out, 1)
    # Hoist the K per-tap lane broadcasts out of the batch loop (JAX does not
    # CSE broadcast_in_dim, so don't re-emit them B_tile times).
    taps = [jnp.broadcast_to(wdw_ref[:, k:k + 1], (C_in, L_out))
            for k in range(K)]

    for b in range(B_tile):                                 # static unroll
        xb = x_ref[b]                                       # (C_in, L_in)
        # Depthwise conv: K static lane-shifted multiply-accumulates (VPU).
        # NOTE(perf): the shifted slices cross the 128-lane tile boundary; at
        # these sizes the relayout cost is negligible (MXU/XLU have slack).
        dw = taps[0] * xb[:, 0:L_out]
        for k in range(1, K):
            dw = dw + taps[k] * xb[:, k * dil:k * dil + L_out]
        # Pointwise 1x1 conv (BatchNorm + depthwise bias already folded):
        # one MXU matmul per element; weights stay resident across the tile.
        acc = jnp.dot(wpw, dw, preferred_element_type=jnp.float32) + bpw
        # ReLU; Dropout1d is the identity in eval mode. Lane-dense store.
        o_ref[b] = jnp.maximum(acc, 0.0).astype(o_ref.dtype)


# --------------------------------- wrapper ------------------------------------

def _pick_batch_tile(N, target=8):
    """Largest divisor of N that is <= target and keeps the grid length >= 2
    (so the batch axis can still be sharded across both v7x TensorCores)."""
    if N <= 1:
        return max(N, 1)
    cap = max(1, min(target, N // 2))
    for bt in range(cap, 0, -1):
        if N % bt == 0:
            return bt
    return 1


def subblock_forward(x, w_dw, b_dw, w_pw, b_pw, gamma, beta, mean, var,
                     *, eps=1e-5, dilation=1, batch_tile=None):
    """SubBlock forward (eval mode), PyTorch NCL layout.

    x:    (N, C_in, L_in)  float32
    w_dw: (C_in, 1, K)     depthwise Conv1d weight (groups = C_in)
    b_dw: (C_in,)          depthwise Conv1d bias
    w_pw: (C_out, C_in, 1) pointwise Conv1d weight
    b_pw: (C_out,)         pointwise Conv1d bias
    gamma/beta/mean/var: (C_out,) BatchNorm1d parameters / running stats
    """
    N, C_in, L_in = x.shape
    C_out = w_pw.shape[0]
    K = w_dw.shape[2]
    L_out = L_in - dilation * (K - 1)
    if L_out <= 0:
        raise ValueError(f"L_in={L_in} too short for kernel_size={K}, "
                         f"dilation={dilation} (L_out={L_out})")

    if batch_tile is None:
        batch_tile = _pick_batch_tile(N)
    if N % batch_tile != 0:
        raise ValueError(f"batch_tile={batch_tile} must divide N={N}")
    grid = (N // batch_tile,)

    # --- fold BatchNorm (frozen scale/shift) AND the depthwise bias into the
    #     pointwise conv: y = (wpw*scale) @ dw_nobias + (wpw*scale) @ b_dw
    #                        + b_pw*scale + (beta - mean*scale)
    scale = gamma / jnp.sqrt(var + eps)                      # (C_out,)
    shift = beta - mean * scale
    wpw_f = w_pw[:, :, 0] * scale[:, None]                   # (C_out, C_in)
    bpw_f = (b_pw * scale + shift + wpw_f @ b_dw).reshape(C_out, 1)
    wdw = w_dw[:, 0, :]                                      # (C_in, K)

    kernel = functools.partial(_subblock_kernel, K=K, dil=dilation, L_out=L_out)
    return pl.pallas_call(
        kernel,
        out_shape=jax.ShapeDtypeStruct((N, C_out, L_out), jnp.float32),
        grid=grid,
        in_specs=[
            pl.BlockSpec((batch_tile, C_in, L_in), lambda n: (n, 0, 0)),
            pl.BlockSpec((C_in, K), lambda n: (0, 0)),
            pl.BlockSpec((C_out, C_in), lambda n: (0, 0)),
            pl.BlockSpec((C_out, 1), lambda n: (0, 0)),
        ],
        out_specs=pl.BlockSpec((batch_tile, C_out, L_out), lambda n: (n, 0, 0)),
        compiler_params=pltpu.CompilerParams(
            dimension_semantics=("parallel",)),
    )(x, wdw, wpw_f, bpw_f)


# ----------------------------- pure-JAX reference -----------------------------

def _subblock_ref(x, w_dw, b_dw, w_pw, b_pw, gamma, beta, mean, var,
                  *, eps=1e-5, dilation=1):
    dn = ("NCH", "OIH", "NCH")
    dw = jax.lax.conv_general_dilated(
        x, w_dw, window_strides=(1,), padding="VALID",
        rhs_dilation=(dilation,), dimension_numbers=dn,
        feature_group_count=x.shape[1])
    dw = dw + b_dw[None, :, None]
    pw = jax.lax.conv_general_dilated(
        dw, w_pw, window_strides=(1,), padding="VALID", dimension_numbers=dn)
    pw = pw + b_pw[None, :, None]
    scale = gamma / jnp.sqrt(var + eps)
    y = (pw - mean[None, :, None]) * scale[None, :, None] + beta[None, :, None]
    return jnp.maximum(y, 0.0)                               # dropout = identity


# ----------------------------------- main --------------------------------------

if __name__ == "__main__":
    # Shapes consistent with SubBlock(in_channels=32, out_channels=64,
    # kernel_size=5).  L_in chosen so L_out = 128 -> lane-dense output.
    # N=8 -> batch_tile=4, grid=(2,): per-step overhead amortized over 4
    # elements while keeping 2 grid steps for v7x's two TensorCores.
    N, C_in, C_out, K, dil = 8, 32, 64, 5, 1
    L_in = 132                                   # L_out = 132 - 4 = 128
    eps = 1e-5

    key = jax.random.PRNGKey(0)
    kx, k1, k2, k3, k4 = jax.random.split(key, 5)
    x = jax.random.normal(kx, (N, C_in, L_in), jnp.float32)

    # PyTorch Conv1d default init: U(-1/sqrt(fan_in), 1/sqrt(fan_in)).
    bd = 1.0 / np.sqrt(1 * K)                    # depthwise fan_in = 1*K
    w_dw = jax.random.uniform(k1, (C_in, 1, K), jnp.float32, -bd, bd)
    b_dw = jax.random.uniform(k2, (C_in,), jnp.float32, -bd, bd)
    bp = 1.0 / np.sqrt(C_in * 1)                 # pointwise fan_in = C_in*1
    w_pw = jax.random.uniform(k3, (C_out, C_in, 1), jnp.float32, -bp, bp)
    b_pw = jax.random.uniform(k4, (C_out,), jnp.float32, -bp, bp)

    # Freshly-initialized BatchNorm1d running statistics (eval-mode semantics).
    gamma = jnp.ones((C_out,), jnp.float32)
    beta = jnp.zeros((C_out,), jnp.float32)
    mean = jnp.zeros((C_out,), jnp.float32)
    var = jnp.ones((C_out,), jnp.float32)

    out = subblock_forward(x, w_dw, b_dw, w_pw, b_pw, gamma, beta, mean, var,
                           eps=eps, dilation=dil)
    out = jax.block_until_ready(out)
    assert out.shape == (N, C_out, L_in - dil * (K - 1))
    assert out.dtype == jnp.float32

    ref = _subblock_ref(x, w_dw, b_dw, w_pw, b_pw, gamma, beta, mean, var,
                        eps=eps, dilation=dil)
    np.testing.assert_allclose(np.asarray(out), np.asarray(ref),
                               rtol=5e-3, atol=5e-3)
    print("KERNEL_OK")
</pallas_src>

<mosaic_0001>
module attributes {stable_mosaic.version = 11 : i64} {
  func.func @_subblock_kernel(%arg0: i32, %arg1: memref<4x32x132xf32, #tpu.memory_space<vmem>>, %arg2: memref<32x5xf32, #tpu.memory_space<vmem>>, %arg3: memref<64x32xf32, #tpu.memory_space<vmem>>, %arg4: memref<64x1xf32, #tpu.memory_space<vmem>>, %arg5: memref<4x64x128xf32, #tpu.memory_space<vmem>>) attributes {dimension_semantics = [#tpu.dimension_semantics<parallel>], iteration_bounds = array<i64: 2>, scalar_prefetch = 0 : i64, scratch_operands = 0 : i64, tpu.core_type = #tpu.core_type<tc>, window_params = [{transform_indices = @transform_0, window_bounds = array<i64: 4, 32, 132>}, {pipeline_mode = #tpu.pipeline_mode<synchronous>, transform_indices = @transform_1, window_bounds = array<i64: 32, 5>}, {pipeline_mode = #tpu.pipeline_mode<synchronous>, transform_indices = @transform_2, window_bounds = array<i64: 64, 32>}, {pipeline_mode = #tpu.pipeline_mode<synchronous>, transform_indices = @transform_3, window_bounds = array<i64: 64, 1>}, {transform_indices = @transform_4, window_bounds = array<i64: 4, 64, 128>}]} {
    %c0 = arith.constant 0 : index
    %c0_0 = arith.constant 0 : index
    %0 = vector.load %arg3[%c0, %c0_0] : memref<64x32xf32, #tpu.memory_space<vmem>>, vector<64x32xf32>
    %c0_1 = arith.constant 0 : index
    %c0_2 = arith.constant 0 : index
    %1 = vector.load %arg4[%c0_1, %c0_2] : memref<64x1xf32, #tpu.memory_space<vmem>>, vector<64x1xf32>
    %c0_3 = arith.constant 0 : index
    %c0_4 = arith.constant 0 : index
    %2 = vector.load %arg2[%c0_3, %c0_4] : memref<32x5xf32, #tpu.memory_space<vmem>>, vector<32x1xf32>
    %3 = vector.shape_cast %2 : vector<32x1xf32> to vector<32x1xf32>
    %4 = vector.broadcast %3 : vector<32x1xf32> to vector<32x128xf32>
    %c0_5 = arith.constant 0 : index
    %c1 = arith.constant 1 : index
    %5 = vector.load %arg2[%c0_5, %c1] : memref<32x5xf32, #tpu.memory_space<vmem>>, vector<32x1xf32>
    %6 = vector.shape_cast %5 : vector<32x1xf32> to vector<32x1xf32>
    %7 = vector.broadcast %6 : vector<32x1xf32> to vector<32x128xf32>
    %c0_6 = arith.constant 0 : index
    %c2 = arith.constant 2 : index
    %8 = vector.load %arg2[%c0_6, %c2] : memref<32x5xf32, #tpu.memory_space<vmem>>, vector<32x1xf32>
    %9 = vector.shape_cast %8 : vector<32x1xf32> to vector<32x1xf32>
    %10 = vector.broadcast %9 : vector<32x1xf32> to vector<32x128xf32>
    %c0_7 = arith.constant 0 : index
    %c3 = arith.constant 3 : index
    %11 = vector.load %arg2[%c0_7, %c3] : memref<32x5xf32, #tpu.memory_space<vmem>>, vector<32x1xf32>
    %12 = vector.shape_cast %11 : vector<32x1xf32> to vector<32x1xf32>
    %13 = vector.broadcast %12 : vector<32x1xf32> to vector<32x128xf32>
    %c0_8 = arith.constant 0 : index
    %c4 = arith.constant 4 : index
    %14 = vector.load %arg2[%c0_8, %c4] : memref<32x5xf32, #tpu.memory_space<vmem>>, vector<32x1xf32>
    %15 = vector.shape_cast %14 : vector<32x1xf32> to vector<32x1xf32>
    %16 = vector.broadcast %15 : vector<32x1xf32> to vector<32x128xf32>
    %c0_9 = arith.constant 0 : index
    %c0_10 = arith.constant 0 : index
    %c0_11 = arith.constant 0 : index
    %17 = vector.load %arg1[%c0_9, %c0_10, %c0_11] : memref<4x32x132xf32, #tpu.memory_space<vmem>>, vector<1x32x132xf32>
    %18 = vector.shape_cast %17 : vector<1x32x132xf32> to vector<32x132xf32>
    %19 = vector.extract_strided_slice %18 {offsets = [0, 0], sizes = [32, 128], strides = [1, 1]} : vector<32x132xf32> to vector<32x128xf32>
    %20 = arith.mulf %4, %19 : vector<32x128xf32>
    %21 = vector.extract_strided_slice %18 {offsets = [0, 1], sizes = [32, 128], strides = [1, 1]} : vector<32x132xf32> to vector<32x128xf32>
    %22 = arith.mulf %7, %21 : vector<32x128xf32>
    %23 = arith.addf %20, %22 : vector<32x128xf32>
    %24 = vector.extract_strided_slice %18 {offsets = [0, 2], sizes = [32, 128], strides = [1, 1]} : vector<32x132xf32> to vector<32x128xf32>
    %25 = arith.mulf %10, %24 : vector<32x128xf32>
    %26 = arith.addf %23, %25 : vector<32x128xf32>
    %27 = vector.extract_strided_slice %18 {offsets = [0, 3], sizes = [32, 128], strides = [1, 1]} : vector<32x132xf32> to vector<32x128xf32>
    %28 = arith.mulf %13, %27 : vector<32x128xf32>
    %29 = arith.addf %26, %28 : vector<32x128xf32>
    %30 = vector.extract_strided_slice %18 {offsets = [0, 4], sizes = [32, 128], strides = [1, 1]} : vector<32x132xf32> to vector<32x128xf32>
    %31 = arith.mulf %16, %30 : vector<32x128xf32>
    %32 = arith.addf %29, %31 : vector<32x128xf32>
    %cst = arith.constant dense<0.000000e+00> : vector<64x128xf32>
    %33 = tpu.matmul %0, %32, %cst {dimension_numbers = #tpu.dot_dimension_numbers<[1], [0], [0], [1], [0, 0, 1, 1], [], []>} : vector<64x32xf32>, vector<32x128xf32>, vector<64x128xf32> -> vector<64x128xf32>
    %34 = vector.broadcast %1 : vector<64x1xf32> to vector<64x128xf32>
    %35 = arith.addf %33, %34 : vector<64x128xf32>
    %cst_12 = arith.constant 0.000000e+00 : f32
    %36 = vector.broadcast %cst_12 : f32 to vector<64x128xf32>
    %37 = arith.maximumf %35, %36 : vector<64x128xf32>
    %c0_13 = arith.constant 0 : index
    %c0_14 = arith.constant 0 : index
    %c0_15 = arith.constant 0 : index
    %38 = vector.load %arg5[%c0_13, %c0_14, %c0_15] : memref<4x64x128xf32, #tpu.memory_space<vmem>>, vector<1x64x128xf32>
    %39 = vector.shape_cast %38 : vector<1x64x128xf32> to vector<64x128xf32>
    %40 = vector.shape_cast %37 : vector<64x128xf32> to vector<1x64x128xf32>
    tpu.vector_store %arg5[%c0_13, %c0_14, %c0_15], %40 {strides = array<i32>} : memref<4x64x128xf32, #tpu.memory_space<vmem>>, vector<1x64x128xf32>,
    %c1_16 = arith.constant 1 : index
    %c0_17 = arith.constant 0 : index
    %c0_18 = arith.constant 0 : index
    %41 = vector.load %arg1[%c1_16, %c0_17, %c0_18] : memref<4x32x132xf32, #tpu.memory_space<vmem>>, vector<1x32x132xf32>
    %42 = vector.shape_cast %41 : vector<1x32x132xf32> to vector<32x132xf32>
    %43 = vector.extract_strided_slice %42 {offsets = [0, 0], sizes = [32, 128], strides = [1, 1]} : vector<32x132xf32> to vector<32x128xf32>
    %44 = arith.mulf %4, %43 : vector<32x128xf32>
    %45 = vector.extract_strided_slice %42 {offsets = [0, 1], sizes = [32, 128], strides = [1, 1]} : vector<32x132xf32> to vector<32x128xf32>
    %46 = arith.mulf %7, %45 : vector<32x128xf32>
    %47 = arith.addf %44, %46 : vector<32x128xf32>
    %48 = vector.extract_strided_slice %42 {offsets = [0, 2], sizes = [32, 128], strides = [1, 1]} : vector<32x132xf32> to vector<32x128xf32>
    %49 = arith.mulf %10, %48 : vector<32x128xf32>
    %50 = arith.addf %47, %49 : vector<32x128xf32>
    %51 = vector.extract_strided_slice %42 {offsets = [0, 3], sizes = [32, 128], strides = [1, 1]} : vector<32x132xf32> to vector<32x128xf32>
    %52 = arith.mulf %13, %51 : vector<32x128xf32>
    %53 = arith.addf %50, %52 : vector<32x128xf32>
    %54 = vector.extract_strided_slice %42 {offsets = [0, 4], sizes = [32, 128], strides = [1, 1]} : vector<32x132xf32> to vector<32x128xf32>
    %55 = arith.mulf %16, %54 : vector<32x128xf32>
    %56 = arith.addf %53, %55 : vector<32x128xf32>
    %cst_19 = arith.constant dense<0.000000e+00> : vector<64x128xf32>
    %57 = tpu.matmul %0, %56, %cst_19 {dimension_numbers = #tpu.dot_dimension_numbers<[1], [0], [0], [1], [0, 0, 1, 1], [], []>} : vector<64x32xf32>, vector<32x128xf32>, vector<64x128xf32> -> vector<64x128xf32>
    %58 = vector.broadcast %1 : vector<64x1xf32> to vector<64x128xf32>
    %59 = arith.addf %57, %58 : vector<64x128xf32>
    %cst_20 = arith.constant 0.000000e+00 : f32
    %60 = vector.broadcast %cst_20 : f32 to vector<64x128xf32>
    %61 = arith.maximumf %59, %60 : vector<64x128xf32>
    %c1_21 = arith.constant 1 : index
    %c0_22 = arith.constant 0 : index
    %c0_23 = arith.constant 0 : index
    %62 = vector.load %arg5[%c1_21, %c0_22, %c0_23] : memref<4x64x128xf32, #tpu.memory_space<vmem>>, vector<1x64x128xf32>
    %63 = vector.shape_cast %62 : vector<1x64x128xf32> to vector<64x128xf32>
    %64 = vector.shape_cast %61 : vector<64x128xf32> to vector<1x64x128xf32>
    tpu.vector_store %arg5[%c1_21, %c0_22, %c0_23], %64 {strides = array<i32>} : memref<4x64x128xf32, #tpu.memory_space<vmem>>, vector<1x64x128xf32>,
    %c2_24 = arith.constant 2 : index
    %c0_25 = arith.constant 0 : index
    %c0_26 = arith.constant 0 : index
    %65 = vector.load %arg1[%c2_24, %c0_25, %c0_26] : memref<4x32x132xf32, #tpu.memory_space<vmem>>, vector<1x32x132xf32>
    %66 = vector.shape_cast %65 : vector<1x32x132xf32> to vector<32x132xf32>
    %67 = vector.extract_strided_slice %66 {offsets = [0, 0], sizes = [32, 128], strides = [1, 1]} : vector<32x132xf32> to vector<32x128xf32>
    %68 = arith.mulf %4, %67 : vector<32x128xf32>
    %69 = vector.extract_strided_slice %66 {offsets = [0, 1], sizes = [32, 128], strides = [1, 1]} : vector<32x132xf32> to vector<32x128xf32>
    %70 = arith.mulf %7, %69 : vector<32x128xf32>
    %71 = arith.addf %68, %70 : vector<32x128xf32>
    %72 = vector.extract_strided_slice %66 {offsets = [0, 2], sizes = [32, 128], strides = [1, 1]} : vector<32x132xf32> to vector<32x128xf32>
    %73 = arith.mulf %10, %72 : vector<32x128xf32>
    %74 = arith.addf %71, %73 : vector<32x128xf32>
    %75 = vector.extract_strided_slice %66 {offsets = [0, 3], sizes = [32, 128], strides = [1, 1]} : vector<32x132xf32> to vector<32x128xf32>
    %76 = arith.mulf %13, %75 : vector<32x128xf32>
    %77 = arith.addf %74, %76 : vector<32x128xf32>
    %78 = vector.extract_strided_slice %66 {offsets = [0, 4], sizes = [32, 128], strides = [1, 1]} : vector<32x132xf32> to vector<32x128xf32>
    %79 = arith.mulf %16, %78 : vector<32x128xf32>
    %80 = arith.addf %77, %79 : vector<32x128xf32>
    %cst_27 = arith.constant dense<0.000000e+00> : vector<64x128xf32>
    %81 = tpu.matmul %0, %80, %cst_27 {dimension_numbers = #tpu.dot_dimension_numbers<[1], [0], [0], [1], [0, 0, 1, 1], [], []>} : vector<64x32xf32>, vector<32x128xf32>, vector<64x128xf32> -> vector<64x128xf32>
    %82 = vector.broadcast %1 : vector<64x1xf32> to vector<64x128xf32>
    %83 = arith.addf %81, %82 : vector<64x128xf32>
    %cst_28 = arith.constant 0.000000e+00 : f32
    %84 = vector.broadcast %cst_28 : f32 to vector<64x128xf32>
    %85 = arith.maximumf %83, %84 : vector<64x128xf32>
    %c2_29 = arith.constant 2 : index
    %c0_30 = arith.constant 0 : index
    %c0_31 = arith.constant 0 : index
    %86 = vector.load %arg5[%c2_29, %c0_30, %c0_31] : memref<4x64x128xf32, #tpu.memory_space<vmem>>, vector<1x64x128xf32>
    %87 = vector.shape_cast %86 : vector<1x64x128xf32> to vector<64x128xf32>
    %88 = vector.shape_cast %85 : vector<64x128xf32> to vector<1x64x128xf32>
    tpu.vector_store %arg5[%c2_29, %c0_30, %c0_31], %88 {strides = array<i32>} : memref<4x64x128xf32, #tpu.memory_space<vmem>>, vector<1x64x128xf32>,
    %c3_32 = arith.constant 3 : index
    %c0_33 = arith.constant 0 : index
    %c0_34 = arith.constant 0 : index
    %89 = vector.load %arg1[%c3_32, %c0_33, %c0_34] : memref<4x32x132xf32, #tpu.memory_space<vmem>>, vector<1x32x132xf32>
    %90 = vector.shape_cast %89 : vector<1x32x132xf32> to vector<32x132xf32>
    %91 = vector.extract_strided_slice %90 {offsets = [0, 0], sizes = [32, 128], strides = [1, 1]} : vector<32x132xf32> to vector<32x128xf32>
    %92 = arith.mulf %4, %91 : vector<32x128xf32>
    %93 = vector.extract_strided_slice %90 {offsets = [0, 1], sizes = [32, 128], strides = [1, 1]} : vector<32x132xf32> to vector<32x128xf32>
    %94 = arith.mulf %7, %93 : vector<32x128xf32>
    %95 = arith.addf %92, %94 : vector<32x128xf32>
    %96 = vector.extract_strided_slice %90 {offsets = [0, 2], sizes = [32, 128], strides = [1, 1]} : vector<32x132xf32> to vector<32x128xf32>
    %97 = arith.mulf %10, %96 : vector<32x128xf32>
    %98 = arith.addf %95, %97 : vector<32x128xf32>
    %99 = vector.extract_strided_slice %90 {offsets = [0, 3], sizes = [32, 128], strides = [1, 1]} : vector<32x132xf32> to vector<32x128xf32>
    %100 = arith.mulf %13, %99 : vector<32x128xf32>
    %101 = arith.addf %98, %100 : vector<32x128xf32>
    %102 = vector.extract_strided_slice %90 {offsets = [0, 4], sizes = [32, 128], strides = [1, 1]} : vector<32x132xf32> to vector<32x128xf32>
    %103 = arith.mulf %16, %102 : vector<32x128xf32>
    %104 = arith.addf %101, %103 : vector<32x128xf32>
    %cst_35 = arith.constant dense<0.000000e+00> : vector<64x128xf32>
    %105 = tpu.matmul %0, %104, %cst_35 {dimension_numbers = #tpu.dot_dimension_numbers<[1], [0], [0], [1], [0, 0, 1, 1], [], []>} : vector<64x32xf32>, vector<32x128xf32>, vector<64x128xf32> -> vector<64x128xf32>
    %106 = vector.broadcast %1 : vector<64x1xf32> to vector<64x128xf32>
    %107 = arith.addf %105, %106 : vector<64x128xf32>
    %cst_36 = arith.constant 0.000000e+00 : f32
    %108 = vector.broadcast %cst_36 : f32 to vector<64x128xf32>
    %109 = arith.maximumf %107, %108 : vector<64x128xf32>
    %c3_37 = arith.constant 3 : index
    %c0_38 = arith.constant 0 : index
    %c0_39 = arith.constant 0 : index
    %110 = vector.load %arg5[%c3_37, %c0_38, %c0_39] : memref<4x64x128xf32, #tpu.memory_space<vmem>>, vector<1x64x128xf32>
    %111 = vector.shape_cast %110 : vector<1x64x128xf32> to vector<64x128xf32>
    %112 = vector.shape_cast %109 : vector<64x128xf32> to vector<1x64x128xf32>
    tpu.vector_store %arg5[%c3_37, %c0_38, %c0_39], %112 {strides = array<i32>} : memref<4x64x128xf32, #tpu.memory_space<vmem>>, vector<1x64x128xf32>,
    return
  }
  func.func @transform_0(%arg0: i32) -> (i32, i32, i32) {
    %c0_i32 = arith.constant 0 : i32
    %c0_i32_0 = arith.constant 0 : i32
    %c0_i32_1 = arith.constant 0 : i32
    return %arg0, %c0_i32, %c0_i32_0 : i32, i32, i32
  }
  func.func @transform_1(%arg0: i32) -> (i32, i32) {
    %c0_i32 = arith.constant 0 : i32
    %c0_i32_0 = arith.constant 0 : i32
    %c0_i32_1 = arith.constant 0 : i32
    return %c0_i32, %c0_i32_0 : i32, i32
  }
  func.func @transform_2(%arg0: i32) -> (i32, i32) {
    %c0_i32 = arith.constant 0 : i32
    %c0_i32_0 = arith.constant 0 : i32
    %c0_i32_1 = arith.constant 0 : i32
    return %c0_i32, %c0_i32_0 : i32, i32
  }
  func.func @transform_3(%arg0: i32) -> (i32, i32) {
    %c0_i32 = arith.constant 0 : i32
    %c0_i32_0 = arith.constant 0 : i32
    %c0_i32_1 = arith.constant 0 : i32
    return %c0_i32, %c0_i32_0 : i32, i32
  }
  func.func @transform_4(%arg0: i32) -> (i32, i32, i32) {
    %c0_i32 = arith.constant 0 : i32
    %c0_i32_0 = arith.constant 0 : i32
    %c0_i32_1 = arith.constant 0 : i32
    return %arg0, %c0_i32, %c0_i32_0 : i32, i32, i32
  }
}

</mosaic_0001>

<bundles_post_ra>
// kernel: tpu_custom_call.1
= control target key start
LH: loop header
LB: loop body
LE: loop exit
PB: predicated region body
PF: predicated region fallthrough
CT: control target
= control target key end

     0   :  { %9 = vsyncpa [#allocation3], 0  ;;  %s2896_s0 = inlined_call_operand.hbm [shape: f32[8,32,132], index: 0, kind: input, shape index: {}]   ;;  %s2897_s1 = inlined_call_operand.vmem [shape: f32[32,5], index: 1, kind: input, shape index: {}]   ;;  %s2898_s2 = inlined_call_operand.vmem [shape: f32[64,32], index: 2, kind: input, shape index: {}]   ;;  %s2899_s3 = inlined_call_operand.vmem [shape: f32[64,1], index: 3, kind: input, shape index: {}]   ;;  %s2900_s4 = inlined_call_operand.hbm [shape: f32[8,64,128], index: 4, kind: output, shape index: {}]  }
   0x1   :  { %11 = vsyncpa [#allocation3 + $0x1], 0 }
   0x2   :  { %12 = vsyncpa [#allocation4], 0 }
   0x3   :  { %14 = vsyncpa [#allocation4 + $0x1], 0  ;;  %s1780_s15 = smov 0   ;;  %s1782_s16 = smov 0  }
   0x4   :  { %s1784_s17 = smov 0   ;;  %s1786_s18 = smov 0  }
   0x5 LB: > { %s1801_s19 = sadd.s32 4294967295, %s1740_s18   ;;  %s1470_s20 = sadd.s32 4294967294, %s1740_s18   ;;  %s1740_s18 = sphi %s1786_s18, %s2981_s18   ;;  %s1736_s17 = sphi %s1784_s17, %s2980_s17   ;;  %s1732_s16 = sphi %s1782_s16, %s2979_s16   ;;  %s1728_s15 = sphi %s1780_s15, %s2978_s15  }
   0x6   : > { %s1805_s21 = sadd.s32 1, %s1740_s18   ;;  %s27_s22 = sadd.s32 1, %s1736_s17 }
   0x7   : > { %s24_s23 = ssub.s32 %s1740_s18, %s1805_s21  ;;  %p34_p0 = scmp.ne.s32.totalorder %s1736_s17, %s1732_s16 }
   0x8   : > { %p25_p1 = scmp.eq.s32.totalorder %s24_s23, 0  ;;  %p35_p2 = scmp.eq.s32.totalorder %s1740_s18, 0 }
   0x9   : > { %p40_p3 = scmp.ne.s32.totalorder %s1732_s16, %s1728_s15  ;;  %p41_p4 = scmp.eq.s32.totalorder %s1801_s19, 0 }
   0xa   : > { %s1817_s24 = scalar_select %p25_p1, %s1736_s17, %s27_s22  }
   0xb   : > { %p1819_p5 = por %p35_p2, %p34_p0  ;;  %p1823_p6 = por %p41_p4, %p40_p3 }
   0xc   : > { %p127_p7 = scmp.eq.s32.totalorder %s1801_s19, 1  ;;  %p133_p8 = scmp.eq.s32.totalorder %s1470_s20, 1 }
   0xd   : > { %p1582_p10 = scmp.lt.s32.totalorder %s1740_s18, 2  ;;  %s162_s29 = sand.u32 1, %s1736_s17  }
   0xe   : > { %p1830_p11 = por %p127_p7, %p34_p0  ;;  %p1834_p12 = por %p133_p8, %p40_p3 }
   0xf   : > { %s1567_s30 = sshll.u32 %s1740_s18, 8  ;;  %s1473_s5 = sshll.u32 %s162_s29, 8 }
  0x10   : > { %s172_s8 = scalar_lea.hbm %s2896_s0, %s1567_s30  ;;  %s166_s10 = scalar_lea.vmem [#allocation2], %s1473_s5 }
  0x11   : > { %s173_s9 = sshll.u32 %s172_s8, 4  ;;  %s175_s11 = sshll.u32 %s166_s10, 4  ;;  %s174_s9 = int_to_ptr.hbm [resolvable:$true] %s173_s9  ;;  %s176_s11 = int_to_ptr.vmem [resolvable:$true] %s175_s11 }
  0x12   : > { %p1845_p13 = pnand %p1582_p10, %p1819_p5  ;;  %p1477_p0 = scmp.ge.s32.totalorder %s1740_s18, 1 }
  0x13   : > { %p183_p1 = scmp.lt.s32.totalorder %s1740_s18, 3  ;;  %s163_s13 = scalar_lea.sflag [#allocation3], %s162_s29 }
  0x14   : > { %s1644_s14 = sshra.s32 %s174_s9, 4  ;;  %p1648_p3 = pneg %p1845_p13  ;;  %s1645_s14 = int_to_ptr.hbm [resolvable:$true] %s1644_s14 }
  0x15   : > { %s1646_s20 = scalar_lea.hbm %s1645_s14, 256  ;;  %s1651_s25 = scalar_lea.hbm %s2896_s0, 512 }
  0x16   : > { %p1647_p2 = scmp.ne.s32.totalorder %s1645_s14, %s1646_s20  ;;  %p1652_p5 = scmp.lt.s32.totalorder %s1645_s14, %s2896_s0 }
  0x17   : > { %p1653_p8 = scmp.lt.s32.totalorder %s1651_s25, %s1646_s20 }
  0x18   : > { %p1649_p4 = pnand %p1648_p3, %p1647_p2 }
  0x19   : > { %p1654_p10 = por %p1653_p8, %p1652_p5 }
  0x1a   : > { %p1650_p7 = pneg %p1649_p4 }
  0x1c   : > { %p1655_p9 = pnand %p1654_p10, %p1650_p7 }
  0x1e   : > { %1658 = shalt.err (!%p1655_p9)
}
  0x1f   : > { %s1742_s29 = smov 256   ;;  %s1743_s6 = smov 16  }
  0x20   : > { %1577 = dma.hbm_to_vmem [thread:$0]  (!%p1845_p13), %s174_s9, 4096, %s176_s11, %s163_s13, %s1742_s29, %s1742_s29, %s1743_s6  }
  0x21   : > { %p184_p2 = pnand %p1477_p0, %p183_p1 }
  0x23   : > { %187 = sbr.rel (%p184_p2) target bundleno = 830 (0x33e), region = 36 }
  0x28   : > { %s1866_s7 = sand.u32 1, %s1732_s16  }
  0x29   : > { %s1478_s8 = sshll.u32 %s1866_s7, 8  ;;  %s190_s10 = scalar_lea.sflag [#allocation3], %s1866_s7 }
  0x2a   : > { %s1872_s14 = scalar_lea.vmem [#allocation2], %s1478_s8 }
  0x2b   : > { %1719 = dma.done.wait (%p1823_p6), %s190_s10, 4096  }
  0x2c   : > { %1721 = vsyncadd (%p1823_p6), %s190_s10, 4294963200  ;;  %v1744_v0 = vmov 1   ;;  %v1745_v1 = vmov 0   ;;  %v239_v2 = vld [vmem:[%s2897_s1 + $0x10] sm:$0xff]  ;;  %v237_v3 = vld [vmem:[%s2897_s1] sm:$0xff]  ;;  %v1746_v6 = vmov 2  }
  0x2d   : > { %1631 = vset.pattern.permute.xlu0 %v1744_v0  ;;  %1630 = vset.pattern.permute.xlu2 %v1744_v0  ;;  %v240_v4 = vld [vmem:[%s2897_s1 + $0x18] sm:$0xff]  ;;  %v238_v5 = vld [vmem:[%s2897_s1 + $0x8] sm:$0xff]  ;;  %v1747_v7 = vmov 4   ;;  %v1748_v8 = vmov 3   ;;  %v1894_v10 = vld [vmem:[%s1872_s14] sm:$0xff]  ;;  %s1749_s25 = smov 127  }
  0x2e   : > { %1629 = vset.pattern.permute.xlu1 %v1745_v1  ;;  %270 = vperm.xlu0 %1631, %v239_v2   ;;  %v1891_v9 = vld [vmem:[%s1872_s14 + $0x8] sm:$0xff]  ;;  %v1905_v14 = vld [vmem:[%s1872_s14 + $0x10] sm:$0xff]  ;;  %v1908_v15 = vld [vmem:[%s1872_s14 + $0x18] sm:$0xff]  ;;  %s1750_s30 = smov 126   ;;  %s1751_s5 = smov 125   ;;  %vm369_vm0 = vcmask 1039360  }
  0x2f   : > { %253 = vperm.xlu1 %1629, %v239_v2   ;;  %262 = vperm.xlu2 %1630, %v237_v3   ;;  %v1921_v20 = vld [vmem:[%s1872_s14 + $0x20] sm:$0xff]  ;;  %v1924_v21 = vld [vmem:[%s1872_s14 + $0x28] sm:$0xff]  ;;  %v1945_v30 = vld [vmem:[%s1872_s14 + $0x70] sm:$0xff]  ;;  %s1752_s29 = smov 124   ;;  %vm414_vm1 = vcmask 1031168   ;;  %vm459_vm2 = vcmask 1022976  }
  0x30   : > { %v1948_v31 = vld [vmem:[%s1872_s14 + $0x78] sm:$0xff]  ;;  %v1967_v37 = vld [vmem:[%s1872_s14 + $0x30] sm:$0xff]  ;;  %v2005_v51 = vld [vmem:[%s1872_s14 + $0x88] sm:$0xff]  ;;  %vm504_vm3 = vcmask 1014784   ;;  %vm557_vm4 = vcmask 261120   ;;  %s1381_s11 = scalar_lea.sflag [#allocation4], %s1866_s7 }
  0x31   : > { %v1962_v35 = vld [vmem:[%s1872_s14 + $0x38] sm:$0xff]  ;;  %v2009_v52 = vld [vmem:[%s1872_s14 + $0xc8] sm:$0xff]  ;;  %v2038_v62 = vld [vmem:[%s1872_s14 + $0x60] sm:$0xff]  ;;  %s1694_s13 = scalar_lea.hbm %s2900_s4, 512 }
  0x32   : > { %v2042_v63 = vld [vmem:[%s1872_s14 + $0xa0] sm:$0xff] }
  0x33   : > { %2932 = vst [vmem:[#allocation19_spill] sm:$0xff] %v2042_v63 }
  0x36   : > { %1635 = vset.pattern.permute.xlu0 %v1746_v6 }
  0x37   : > { %258 = vperm.xlu1 %1629, %v240_v4   ;;  %266 = vperm.xlu2 %1630, %v238_v5  }
  0x38   : > { %290 = vperm.xlu0 %1635, %v240_v4  }
  0x3f   : > { %1632 = vset.pattern.permute.xlu1 %v1744_v0  ;;  %1633 = vset.pattern.permute.xlu2 %v1746_v6  ;;  %v2045_v0 = vld [vmem:[%s1872_s14 + $0xa8] sm:$0xff] }
  0x40   : > { %274 = vperm.xlu1 %1632, %v240_v4   ;;  %278 = vperm.xlu2 %1633, %v237_v3  }
  0x41   : > { %1638 = vset.pattern.permute.xlu0 %v1747_v7 }
  0x42   : > { %310 = vperm.xlu0 %1638, %v237_v3  }
  0x48   : > { %1634 = vset.pattern.permute.xlu1 %v1746_v6  ;;  %286 = vperm.xlu2 %1633, %v239_v2  }
  0x49   : > { %282 = vperm.xlu1 %1634, %v238_v5  }
  0x4a   : > { %1639 = vset.pattern.permute.xlu0 %v1745_v1 }
  0x4b   : > { %243 = vperm.xlu0 %1639, %v237_v3  }
  0x50   : > { %1637 = vset.pattern.permute.xlu2 %v1748_v8 }
  0x51   : > { %1636 = vset.pattern.permute.xlu1 %v1748_v8  ;;  %298 = vperm.xlu2 %1637, %v238_v5  }
  0x52   : > { %294 = vperm.xlu1 %1636, %v237_v3   ;;  %v2056_v3 = vld [vmem:[%s1872_s14 + $0xe8] sm:$0xff] }
  0x53   : > { %248 = vperm.xlu0 %1639, %v238_v5  }
  0x59   : > { %306 = vperm.xlu2 %1637, %v240_v4  }
  0x5a   : > { %302 = vperm.xlu1 %1636, %v239_v2  }
  0x61   : > { %1641 = vset.pattern.permute.xlu2 %v1747_v7 }
  0x62   : > { %1640 = vset.pattern.permute.xlu1 %v1747_v7  ;;  %318 = vperm.xlu2 %1641, %v239_v2   ;;  %v2053_v2 = vld [vmem:[%s1872_s14 + $0x68] sm:$0xff] }
  0x63   : > { %314 = vperm.xlu1 %1640, %v238_v5  }
  0x6a   : > { %1643 = vset.pattern.permute.xlu2 %v1745_v1 }
  0x6b   : > { %322 = vperm.xlu1 %1640, %v240_v4  }
  0x73   : > { %1642 = vset.pattern.permute.xlu1 %v1745_v1  ;;  %v2048_v1 = vld [vmem:[%s1872_s14 + $0xe0] sm:$0xff] }
  0x89   : > { %v1896_v11 = vpop.permute.xlu2 %262 }
  0x8a   : > { %v338_v12 = vmul.f32 %v1891_v9, %v1896_v11  ;;  %v337_v13 = vmul.f32 %v1894_v10, %v1896_v11 }
  0x8c   : > { %355 = vrot.lane.b32.xlu0 %v338_v12, %s1749_s25  ;;  %353 = vrot.lane.b32.xlu2 %v337_v13, %s1749_s25 }
  0x91   : > { %v1910_v16 = vpop.permute.xlu2 %266 }
  0x92   : > { %v339_v17 = vmul.f32 %v1905_v14, %v1910_v16  ;;  %v340_v18 = vmul.f32 %v1908_v15, %v1910_v16 }
  0x94   : > { %357 = vrot.lane.b32.xlu1 %v339_v17, %s1749_s25  ;;  %359 = vrot.lane.b32.xlu2 %v340_v18, %s1749_s25 }
  0x9a   : > { %v1918_v19 = vpop.permute.xlu2 %278 }
  0x9b   : > { %v382_v27 = vmul.f32 %v1894_v10, %v1918_v19  ;;  %v383_v44 = vmul.f32 %v1891_v9, %v1918_v19 }
  0xa0   : > { %v1926_v22 = vpop.permute.xlu0 %270 }
  0xa1   : > { %v1928_v23 = vpop.permute.xlu1 %253  ;;  %v341_v24 = vmul.f32 %v1921_v20, %v1926_v22  ;;  %v342_v25 = vmul.f32 %v1924_v21, %v1926_v22 }
  0xa2   : > { %v1936_v26 = vpop.permute.xlu2 %286 }
  0xa3   : > { %361 = vrot.lane.b32.xlu0 %v341_v24, %s1749_s25  ;;  %363 = vrot.lane.b32.xlu1 %v342_v25, %s1749_s25  ;;  %v386_v48 = vmul.f32 %v1921_v20, %v1936_v26  ;;  %v387_v50 = vmul.f32 %v1924_v21, %v1936_v26 }
  0xa9   : > { %v1940_v28 = vpop.permute.xlu1 %258 }
  0xaa   : > { %v1942_v29 = vpop.permute.xlu0 %290 }
  0xab   : > { %398 = vrot.lane.b32.xlu1 %v382_v27, %s1750_s30  ;;  %v1951_v32 = vpop.permute.xlu2 %298  ;;  %v1955_v33 = vmul.f32 %v1945_v30, %v1942_v29  ;;  %v1959_v34 = vmul.f32 %v1948_v31, %v1942_v29  ;;  %v388_v47 = vmul.f32 %v1967_v37, %v1942_v29  ;;  %v389_v58 = vmul.f32 %v1962_v35, %v1942_v29 }
  0xac   : > { %2921 = vst [vmem:[#allocation8_spill] sm:$0xff] %v1951_v32  ;;  %v429_v17 = vmul.f32 %v1905_v14, %v1951_v32 }
  0xad   : > { %2922 = vst [vmem:[#allocation9_spill] sm:$0xff] %v1955_v33  ;;  %v2351_v33 = vld [vmem:[%s1872_s14 + $0xd8] sm:$0xff] }
  0xae   : > { %2923 = vst [vmem:[#allocation10_spill] sm:$0xff] %v1959_v34 }
  0xb2   : > { %v1964_v36 = vpop.permute.xlu1 %274 }
  0xb3   : > { %v344_v38 = vmul.f32 %v1962_v35, %v1964_v36  ;;  %v343_v39 = vmul.f32 %v1967_v37, %v1964_v36  ;;  %v1975_v40 = vpop.permute.xlu2 %306 }
  0xb4   : > { %v1979_v41 = vmul.f32 %v1945_v30, %v1975_v40  ;;  %v1983_v42 = vmul.f32 %v1948_v31, %v1975_v40  ;;  %v2025_v57 = vpop.permute.xlu0 %310 }
  0xb5   : > { %367 = vrot.lane.b32.xlu0 %v344_v38, %s1749_s25  ;;  %365 = vrot.lane.b32.xlu2 %v343_v39, %s1749_s25  ;;  %2929 = vst [vmem:[#allocation16_spill] sm:$0xff] %v2025_v57  ;;  %v2031_v59 = vmul.f32 %v2005_v51, %v2025_v57  ;;  %v2035_v60 = vmul.f32 %v2009_v52, %v2025_v57 }
  0xb6   : > { %2924 = vst [vmem:[#allocation11_spill] sm:$0xff] %v1979_v41 }
  0xb7   : > { %2925 = vst [vmem:[#allocation12_spill] sm:$0xff] %v1983_v42 }
  0xb8   : > { %2930 = vst [vmem:[#allocation17_spill] sm:$0xff] %v2031_v59  ;;  %v473_v59 = vmul.f32 %v1891_v9, %v2025_v57 }
  0xb9   : > { %2931 = vst [vmem:[#allocation18_spill] sm:$0xff] %v2035_v60 }
  0xbb   : > { %v1985_v43 = vpop.permute.xlu1 %282 }
  0xbc   : > { %v384_v45 = vmul.f32 %v1905_v14, %v1985_v43  ;;  %v385_v46 = vmul.f32 %v1908_v15, %v1985_v43  ;;  %v319_v7 = vpop.permute.xlu2 %318 }
  0xbd   : > { %400 = vrot.lane.b32.xlu2 %v383_v44, %s1750_s30  ;;  %v2079_v18 = vmul.f32 %v2042_v63, %v319_v7  ;;  %v2082_v24 = vmul.f32 %v2045_v0, %v319_v7  ;;  %v2085_v25 = vmul.f32 %v2048_v1, %v319_v7  ;;  %v2088_v27 = vmul.f32 %v2056_v3, %v319_v7 }
  0xbe   : > { %402 = vrot.lane.b32.xlu0 %v384_v45, %s1750_s30  ;;  %404 = vrot.lane.b32.xlu1 %v385_v46, %s1750_s30  ;;  %v2091_v38 = vmul.f32 %v2053_v2, %v319_v7  ;;  %v2094_v39 = vmul.f32 %v2038_v62, %v319_v7  ;;  %v430_v44 = vmul.f32 %v1908_v15, %v1951_v32  ;;  %v2337_v32 = vld [vmem:[%s1872_s14 + $0xd0] sm:$0xff] }
  0xbf   : > { %2935 = vst [vmem:[#allocation22_spill] sm:$0xff] %v2079_v18  ;;  %v948_v18 = vmul.f32 %v2045_v0, %v1936_v26 }
  0xc0   : > { %2936 = vst [vmem:[#allocation23_spill] sm:$0xff] %v2082_v24  ;;  %v2323_v24 = vld [vmem:[%s1872_s14 + $0x98] sm:$0xff] }
  0xc1   : > { %2937 = vst [vmem:[#allocation24_spill] sm:$0xff] %v2085_v25  ;;  %v902_v34 = vmul.f32 %v2323_v24, %v1910_v16 }
  0xc2   : > { %2938 = vst [vmem:[#allocation25_spill] sm:$0xff] %v2088_v27  ;;  %v1150_v27 = vmul.f32 %v2048_v1, %v1926_v22 }
  0xc3   : > { %2939 = vst [vmem:[#allocation26_spill] sm:$0xff] %v2091_v38  ;;  %v472_v38 = vmul.f32 %v1894_v10, %v2025_v57 }
  0xc4   : > { %v2000_v49 = vpop.permute.xlu1 %294  ;;  %2940 = vst [vmem:[#allocation27_spill] sm:$0xff] %v2094_v39 }
  0xc5   : > { %2926 = vst [vmem:[#allocation13_spill] sm:$0xff] %v2000_v49  ;;  %406 = vrot.lane.b32.xlu2 %v386_v48, %s1750_s30  ;;  %v2013_v53 = vmul.f32 %v2005_v51, %v2000_v49  ;;  %v2019_v54 = vmul.f32 %v2009_v52, %v2000_v49  ;;  %v428_v55 = vmul.f32 %v1891_v9, %v2000_v49 }
  0xc6   : > { %410 = vrot.lane.b32.xlu1 %v388_v47, %s1750_s30  ;;  %408 = vrot.lane.b32.xlu0 %v387_v50, %s1750_s30  ;;  %v427_v56 = vmul.f32 %v1894_v10, %v2000_v49  ;;  %v434_v48 = vmul.f32 %v1962_v35, %v1975_v40  ;;  %v433_v50 = vmul.f32 %v1967_v37, %v1975_v40 }
  0xc7   : > { %2927 = vst [vmem:[#allocation14_spill] sm:$0xff] %v2013_v53  ;;  %v656_v49 = vmul.f32 %v2038_v62, %v1926_v22  ;;  %v2311_v53 = vld [vmem:[%s1872_s14 + $0x90] sm:$0xff] }
  0xc8   : > { %2928 = vst [vmem:[#allocation15_spill] sm:$0xff] %v2019_v54  ;;  %v901_v25 = vmul.f32 %v2311_v53, %v1910_v16 }
  0xcc   : > { %v303_v61 = vpop.permute.xlu1 %302 }
  0xcd   : > { %412 = vrot.lane.b32.xlu2 %v389_v58, %s1750_s30  ;;  %v2059_v4 = vmul.f32 %v2042_v63, %v303_v61  ;;  %v2062_v5 = vmul.f32 %v2045_v0, %v303_v61  ;;  %v2065_v6 = vmul.f32 %v2048_v1, %v303_v61  ;;  %v2068_v8 = vmul.f32 %v2056_v3, %v303_v61  ;;  %v2114_v58 = vld [vmem:[%s1872_s14 + $0xf0] sm:$0xff] }
  0xce   : > { %445 = vrot.lane.b32.xlu1 %v428_v55, %s1751_s5  ;;  %443 = vrot.lane.b32.xlu0 %v427_v56, %s1751_s5  ;;  %v2071_v12 = vmul.f32 %v2038_v62, %v303_v61  ;;  %v2074_v13 = vmul.f32 %v2053_v2, %v303_v61  ;;  %v431_v45 = vmul.f32 %v1921_v20, %v303_v61  ;;  %v2111_v56 = vld [vmem:[%s1872_s14 + $0xb0] sm:$0xff] }
  0xcf   : > { %v432_v47 = vmul.f32 %v1924_v21, %v303_v61  ;;  %v2122_v61 = vld [vmem:[%s1872_s14 + $0xb8] sm:$0xff]  ;;  %v1196_v41 = vmul.f32 %v2114_v58, %v1942_v29 }
  0xd0   : > { %2933 = vst [vmem:[#allocation20_spill] sm:$0xff] %v2071_v12  ;;  %v950_v42 = vmul.f32 %v2122_v61, %v1942_v29 }
  0xd1   : > { %2934 = vst [vmem:[#allocation21_spill] sm:$0xff] %v2074_v13  ;;  %v477_v13 = vmul.f32 %v1924_v21, %v319_v7 }
  0xd5   : > { %447 = vrot.lane.b32.xlu2 %v429_v17, %s1751_s5  ;;  %v2100_v46 = vpop.permute.xlu1 %314  ;;  %v2119_v17 = vld [vmem:[%s1872_s14 + $0xf8] sm:$0xff] }
  0xd6   : > { %2941 = vst [vmem:[#allocation28_spill] sm:$0xff] %v2100_v46  ;;  %451 = vrot.lane.b32.xlu1 %v431_v45, %s1751_s5  ;;  %449 = vrot.lane.b32.xlu0 %v430_v44, %s1751_s5  ;;  %v474_v60 = vmul.f32 %v1905_v14, %v2100_v46  ;;  %v475_v12 = vmul.f32 %v1908_v15, %v2100_v46  ;;  %v230_v15 = vld [vmem:[%s2899_s3 + $0x8] sm:$0xff] }
  0xdd   : > { %453 = vrot.lane.b32.xlu2 %v432_v47, %s1751_s5  ;;  %v323_v55 = vpop.permute.xlu1 %322 }
  0xde   : > { %457 = vrot.lane.b32.xlu1 %v434_v48, %s1751_s5  ;;  %455 = vrot.lane.b32.xlu0 %v433_v50, %s1751_s5  ;;  %v2125_v44 = vmul.f32 %v2111_v56, %v323_v55  ;;  %v2128_v45 = vmul.f32 %v2122_v61, %v323_v55  ;;  %v2131_v47 = vmul.f32 %v2119_v17, %v323_v55 }
  0xdf   : > { %v2134_v39 = vmul.f32 %v2114_v58, %v323_v55  ;;  %v2137_v48 = vmul.f32 %v1945_v30, %v323_v55  ;;  %v2140_v50 = vmul.f32 %v1948_v31, %v323_v55  ;;  %v478_v9 = vmul.f32 %v1967_v37, %v323_v55 }
  0xe0   : > { %v479_v21 = vmul.f32 %v1962_v35, %v323_v55 }
  0xe1   : > { %2942 = vst [vmem:[#allocation29_spill] sm:$0xff] %v2134_v39  ;;  %v994_v39 = vmul.f32 %v2122_v61, %v1975_v40 }
  0xe2   : > { %2943 = vst [vmem:[#allocation30_spill] sm:$0xff] %v2137_v48  ;;  %v2155_v48 = vpop.permute.xlu0 %243 }
  0xe3   : > { %2944 = vst [vmem:[#allocation31_spill] sm:$0xff] %v2140_v50  ;;  %v476_v50 = vmul.f32 %v1921_v20, %v319_v7  ;;  %v231_v7 = vld [vmem:[%s2899_s3 + $0x10] sm:$0xff] }
  0xe5   : > { %488 = vrot.lane.b32.xlu2 %v472_v38, %s1752_s29 }
  0xe6   : > { %492 = vrot.lane.b32.xlu1 %v474_v60, %s1752_s29  ;;  %490 = vrot.lane.b32.xlu0 %v473_v59, %s1752_s29  ;;  %v229_v59 = vld [vmem:[%s2899_s3] sm:$0xff]  ;;  %v354_v35 = vpop.permute.xlu2 %353 }
  0xea   : > { %v2166_v60 = vpop.permute.xlu0 %248 }
  0xed   : > { %494 = vrot.lane.b32.xlu2 %v475_v12, %s1752_s29  ;;  %v232_v12 = vld [vmem:[%s2899_s3 + $0x18] sm:$0xff] }
  0xee   : > { %498 = vrot.lane.b32.xlu1 %v477_v13, %s1752_s29  ;;  %496 = vrot.lane.b32.xlu0 %v476_v50, %s1752_s29  ;;  %v333_v13 = vmul.f32 %v1894_v10, %v2155_v48  ;;  %v234_v10 = vld [vmem:[%s2899_s3 + $0x28] sm:$0xff] }
  0xf5   : > { %500 = vrot.lane.b32.xlu2 %v478_v9, %s1752_s29  ;;  %v233_v9 = vld [vmem:[%s2899_s3 + $0x20] sm:$0xff] }
  0xf6   : > { %502 = vrot.lane.b32.xlu0 %v479_v21, %s1752_s29  ;;  %519 = vperm.xlu1 %1642, %v229_v59   ;;  %v236_v59 = vld [vmem:[%s2899_s3 + $0x38] sm:$0xff]  ;;  %v334_v21 = vmul.f32 %v1905_v14, %v2166_v60 }
  0xfd   : > { %524 = vperm.xlu2 %1643, %v230_v15   ;;  %v360_v15 = vpop.permute.xlu2 %359 }
  0xfe   : > { %529 = vperm.xlu0 %1639, %v231_v7   ;;  %534 = vperm.xlu1 %1642, %v232_v12   ;;  %v356_v38 = vpop.permute.xlu0 %355 }
  0xff   : > { %v370_v55 = vsel %vm369_vm0, %v354_v35, %v356_v38  ;;  %v2199_v38 = vld [vmem:[%s1872_s14 + $0x40] sm:$0xff] }
 0x100   : > { %v378_v50 = vadd.f32 %v370_v55, %v333_v13  ;;  %v2196_v13 = vld [vmem:[%s1872_s14 + $0x50] sm:$0xff] }
 0x101   : > { %v235_v55 = vld [vmem:[%s2899_s3 + $0x30] sm:$0xff]  ;;  %v654_v14 = vmul.f32 %v2196_v13, %v1910_v16 }
 0x105   : > { %539 = vperm.xlu2 %1643, %v233_v9   ;;  %v652_v9 = vmul.f32 %v2199_v38, %v1896_v11 }
 0x106   : > { %554 = vperm.xlu0 %1639, %v236_v59   ;;  %544 = vperm.xlu1 %1642, %v234_v10   ;;  %v358_v7 = vpop.permute.xlu1 %357  ;;  %v2211_v10 = vld [vmem:[%s1872_s14 + $0x48] sm:$0xff] }
 0x107   : > { %v371_v12 = vsel %vm369_vm0, %v358_v7, %v360_v15  ;;  %2945 = vst [vmem:[#allocation32_spill] sm:$0xff] %v2211_v10  ;;  %v653_v15 = vmul.f32 %v2211_v10, %v1896_v11  ;;  %v657_v7 = vmul.f32 %v2053_v2, %v1926_v22 }
 0x108   : > { %v2193_v35 = vadd.f32 %v371_v12, %v334_v21  ;;  %v2214_v21 = vld [vmem:[%s1872_s14 + $0x58] sm:$0xff] }
 0x109   : > { %2946 = vst [vmem:[#allocation33_spill] sm:$0xff] %v2214_v21  ;;  %v655_v12 = vmul.f32 %v2214_v21, %v1910_v16 }
 0x10d   : > { %549 = vperm.xlu2 %1643, %v235_v55  }
 0x10e   : > { %672 = vrot.lane.b32.xlu0 %v654_v14, %s1749_s25  ;;  %668 = vrot.lane.b32.xlu1 %v652_v9, %s1749_s25  ;;  %v335_v14 = vmul.f32 %v1921_v20, %v1928_v23  ;;  %v658_v20 = vmul.f32 %v1945_v30, %v1964_v36 }
 0x10f   : > { %v366_v59 = vpop.permute.xlu2 %365 }
 0x115   : > { %670 = vrot.lane.b32.xlu2 %v653_v15, %s1749_s25  ;;  %v362_v55 = vpop.permute.xlu0 %361  ;;  %v364_v9 = vpop.permute.xlu1 %363  ;;  %v696_v15 = vmul.f32 %v2199_v38, %v1918_v19 }
 0x116   : > { %678 = vrot.lane.b32.xlu0 %v657_v7, %s1749_s25  ;;  %674 = vrot.lane.b32.xlu1 %v655_v12, %s1749_s25  ;;  %v372_v57 = vsel %vm369_vm0, %v362_v55, %v364_v9  ;;  %v699_v9 = vmul.f32 %v2214_v21, %v1985_v43  ;;  %v1151_v21 = vmul.f32 %v2056_v3, %v1926_v22 }
 0x117   : > { %v401_v54 = vpop.permute.xlu2 %400  ;;  %v2228_v46 = vadd.f32 %v372_v57, %v335_v14  ;;  %v659_v14 = vmul.f32 %v1948_v31, %v1964_v36 }
 0x11d   : > { %676 = vrot.lane.b32.xlu2 %v656_v49, %s1749_s25  ;;  %v399_v7 = vpop.permute.xlu1 %398  ;;  %v697_v49 = vmul.f32 %v2211_v10, %v1918_v19  ;;  %v903_v10 = vmul.f32 %v2042_v63, %v1926_v22 }
 0x11e   : > { %712 = vrot.lane.b32.xlu0 %v696_v15, %s1750_s30  ;;  %680 = vrot.lane.b32.xlu1 %v658_v20, %s1749_s25  ;;  %v415_v57 = vsel %vm414_vm1, %v399_v7, %v401_v54  ;;  %v336_v54 = vmul.f32 %v1967_v37, %v1940_v28  ;;  %v698_v7 = vmul.f32 %v2196_v13, %v1985_v43 }
 0x11f   : > { %v2240_v12 = vpop.permute.xlu2 %406  ;;  %v2242_v55 = vadd.f32 %v415_v57, %v378_v50  ;;  %v905_v57 = vmul.f32 %v2111_v56, %v1964_v36 }
 0x125   : > { %682 = vrot.lane.b32.xlu2 %v659_v14, %s1749_s25  ;;  %v700_v14 = vmul.f32 %v2038_v62, %v1936_v26 }
 0x126   : > { %718 = vrot.lane.b32.xlu0 %v699_v9, %s1750_s30  ;;  %714 = vrot.lane.b32.xlu1 %v697_v49, %s1750_s30  ;;  %v701_v49 = vmul.f32 %v2053_v2, %v1936_v26  ;;  %v949_v2 = vmul.f32 %v2111_v56, %v1942_v29 }
 0x127   : > { %v368_v50 = vpop.permute.xlu0 %367  ;;  %v2255_v15 = vpop.permute.xlu2 %412 }
 0x128   : > { %v373_v31 = vsel %vm369_vm0, %v366_v59, %v368_v50  ;;  %v906_v50 = vmul.f32 %v2122_v61, %v1964_v36 }
 0x129   : > { %v2258_v20 = vadd.f32 %v373_v31, %v336_v54  ;;  %v1153_v54 = vmul.f32 %v2119_v17, %v1964_v36 }
 0x12d   : > { %716 = vrot.lane.b32.xlu2 %v698_v7, %s1750_s30 }
 0x12e   : > { %927 = vrot.lane.b32.xlu0 %v905_v57, %s1749_s25  ;;  %720 = vrot.lane.b32.xlu1 %v700_v14, %s1750_s30  ;;  %v1152_v14 = vmul.f32 %v2114_v58, %v1964_v36  ;;  %v904_v36 = vmul.f32 %v2045_v0, %v1926_v22  ;;  %v1197_v22 = vmul.f32 %v2119_v17, %v1942_v29 }
 0x12f   : > { %v2269_v37 = vpop.permute.xlu2 %447  ;;  %v947_v29 = vmul.f32 %v2042_v63, %v1936_v26  ;;  %v1148_v0 = vmul.f32 %v2337_v32, %v1910_v16 }
 0x130   : > { %v2271_v59 = vpop.permute.xlu0 %402  ;;  %v2273_v9 = vpop.permute.xlu1 %404 }
 0x135   : > { %722 = vrot.lane.b32.xlu2 %v701_v49, %s1750_s30 }
 0x136   : > { %1176 = vrot.lane.b32.xlu0 %v1153_v54, %s1749_s25  ;;  %929 = vrot.lane.b32.xlu1 %v906_v50, %s1749_s25 }
 0x137   : > { %v2284_v31 = vpop.permute.xlu2 %453 }
 0x138   : > { %v411_v7 = vpop.permute.xlu1 %410  ;;  %v409_v57 = vpop.permute.xlu0 %408 }
 0x139   : > { %v418_v63 = vsel %vm414_vm1, %v411_v7, %v2255_v15 }
 0x13a   : > { %v426_v15 = vadd.f32 %v418_v63, %v2258_v20 }
 0x13d   : > { %1174 = vrot.lane.b32.xlu2 %v1152_v14, %s1749_s25 }
 0x13e   : > { %971 = vrot.lane.b32.xlu0 %v949_v2, %s1750_s30  ;;  %923 = vrot.lane.b32.xlu1 %v903_v10, %s1749_s25 }
 0x13f   : > { %v2295_v49 = vpop.permute.xlu2 %488 }
 0x140   : > { %v2297_v54 = vpop.permute.xlu1 %445  ;;  %v2299_v50 = vpop.permute.xlu0 %443 }
 0x145   : > { %925 = vrot.lane.b32.xlu2 %v904_v36, %s1749_s25 }
 0x146   : > { %1172 = vrot.lane.b32.xlu0 %v1151_v21, %s1749_s25  ;;  %973 = vrot.lane.b32.xlu1 %v950_v42, %s1750_s30 }
 0x147   : > { %v495_v10 = vpop.permute.xlu2 %494 }
 0x148   : > { %v452_v14 = vpop.permute.xlu1 %451  ;;  %v450_v2 = vpop.permute.xlu0 %449 }
 0x149   : > { %v461_v20 = vsel %vm459_vm2, %v2269_v37, %v450_v2 }
 0x14d   : > { %1170 = vrot.lane.b32.xlu2 %v1150_v27, %s1749_s25 }
 0x14e   : > { %919 = vrot.lane.b32.xlu0 %v901_v25, %s1749_s25  ;;  %1218 = vrot.lane.b32.xlu1 %v1196_v41, %s1750_s30 }
 0x14f   : > { %v501_v42 = vpop.permute.xlu2 %500 }
 0x150   : > { %v458_v21 = vpop.permute.xlu1 %457  ;;  %v456_v36 = vpop.permute.xlu0 %455 }
 0x155   : > { %1220 = vrot.lane.b32.xlu2 %v1197_v22, %s1750_s30  ;;  %v993_v22 = vmul.f32 %v2111_v56, %v1975_v40 }
 0x156   : > { %969 = vrot.lane.b32.xlu0 %v948_v18, %s1750_s30  ;;  %921 = vrot.lane.b32.xlu1 %v902_v34, %s1749_s25 }
 0x157   : > { %v2334_v41 = vpop.permute.xlu2 %524 }
 0x158   : > { %2947 = vst [vmem:[#allocation34_spill] sm:$0xff] %v2334_v41  ;;  %v493_v25 = vpop.permute.xlu1 %492  ;;  %v491_v27 = vpop.permute.xlu0 %490 }
 0x15d   : > { %967 = vrot.lane.b32.xlu2 %v947_v29, %s1750_s30  ;;  %v1195_v29 = vmul.f32 %v2056_v3, %v1936_v26  ;;  %v416_v3 = vsel %vm414_vm1, %v2271_v59, %v2273_v9  ;;  %v2383_v59 = vld [vmem:[%s1872_s14 + $0x80] sm:$0xff] }
 0x15e   : > { %1166 = vrot.lane.b32.xlu0 %v1148_v0, %s1749_s25  ;;  %1015 = vrot.lane.b32.xlu1 %v993_v22, %s1751_s5  ;;  %v1149_v0 = vmul.f32 %v2351_v33, %v1910_v16  ;;  %v417_v22 = vsel %vm414_vm1, %v2240_v12, %v409_v57  ;;  %v462_v16 = vsel %vm459_vm2, %v452_v14, %v2284_v31 }
 0x15f   : > { %v2348_v34 = vpop.permute.xlu2 %539  ;;  %v425_v12 = vadd.f32 %v417_v22, %v2228_v46  ;;  %v424_v9 = vadd.f32 %v416_v3, %v2193_v35  ;;  %v460_v46 = vsel %vm459_vm2, %v2299_v50, %v2297_v54  ;;  %v505_v35 = vsel %vm504_vm3, %v2295_v49, %v491_v27  ;;  %v2409_v27 = vld [vmem:[%s2898_s2] sm:$0xff] }
 0x160   : > { %2948 = vst [vmem:[#allocation35_spill] sm:$0xff] %v2348_v34  ;;  %v499_v18 = vpop.permute.xlu1 %498  ;;  %v497_v41 = vpop.permute.xlu0 %496  ;;  %v463_v34 = vsel %vm459_vm2, %v456_v36, %v458_v21  ;;  %v506_v36 = vsel %vm504_vm3, %v493_v25, %v495_v10  ;;  %v468_v54 = vadd.f32 %v460_v46, %v2242_v55  ;;  %v1241_v55 = vmul.f32 %v2119_v17, %v1975_v40  ;;  %v2464_v46 = vld [vmem:[%s2898_s2 + $0x18] sm:$0xff] }
 0x161   : > { %v471_v63 = vadd.f32 %v463_v34, %v426_v15  ;;  %v507_v57 = vsel %vm504_vm3, %v497_v41, %v499_v18  ;;  %v470_v31 = vadd.f32 %v462_v16, %v425_v12  ;;  %v1194_v34 = vmul.f32 %v2048_v1, %v1936_v26 }
 0x162   : > { %v469_v37 = vadd.f32 %v461_v20, %v424_v9  ;;  %v1240_v41 = vmul.f32 %v2114_v58, %v1975_v40  ;;  %v513_v49 = vadd.f32 %v505_v35, %v468_v54  ;;  %v946_v18 = vmul.f32 %v2323_v24, %v1985_v43  ;;  %v2429_v40 = vld [vmem:[%s2898_s2 + $0x8] sm:$0xff] }
 0x163   : > { %v515_v2 = vadd.f32 %v507_v57, %v470_v31  ;;  %v945_v17 = vmul.f32 %v2311_v53, %v1985_v43  ;;  %v648_v12 = vmul.f32 %v2199_v38, %v2155_v48  ;;  %v649_v31 = vmul.f32 %v2196_v13, %v2166_v60 }
 0x164   : > { %v514_v26 = vadd.f32 %v506_v36, %v469_v37 }
 0x165   : > { %1017 = vrot.lane.b32.xlu2 %v994_v39, %s1751_s5 }
 0x166   : > { %1216 = vrot.lane.b32.xlu0 %v1195_v29, %s1750_s30  ;;  %1168 = vrot.lane.b32.xlu1 %v1149_v0, %s1749_s25  ;;  %v900_v29 = vmul.f32 %v2005_v51, %v1896_v11 }
 0x167   : > { %v2373_v61 = vpop.permute.xlu2 %549 }
 0x168   : > { %v503_v7 = vpop.permute.xlu0 %502  ;;  %v2376_v39 = vpop.permute.xlu1 %519 }
 0x169   : > { %v508_v21 = vsel %vm504_vm3, %v501_v42, %v503_v7  ;;  %v899_v42 = vmul.f32 %v2383_v59, %v1896_v11 }
 0x16a   : > { %v516_v14 = vadd.f32 %v508_v21, %v471_v63  ;;  %v2445_v63 = vld [vmem:[%s2898_s2 + $0x10] sm:$0xff]  ;;  %v650_v21 = vmul.f32 %v2038_v62, %v1928_v23 }
 0x16c   : > { %594 = vmatpush.msra.mxu0 %v516_v14 }
 0x16d   : > { %1214 = vrot.lane.b32.xlu2 %v1194_v34, %s1750_s30 }
 0x16e   : > { %595 = vmatpush.msra.mxu0 %v515_v2  ;;  %915 = vrot.lane.b32.xlu0 %v899_v42, %s1749_s25  ;;  %v1192_v2 = vmul.f32 %v2337_v32, %v1985_v43 }
 0x16f   : > { %1262 = vrot.lane.b32.xlu1 %v1240_v41, %s1751_s5  ;;  %v671_v50 = vpop.permute.xlu2 %670  ;;  %v651_v41 = vmul.f32 %v1945_v30, %v1940_v28 }
 0x170   : > { %596 = vmatpush.msra.mxu0 %v514_v26  ;;  %v2402_v10 = vpop.permute.xlu0 %529  ;;  %v2404_v25 = vpop.permute.xlu1 %534 }
 0x172   : > { %597 = vmatpush.msra.mxu0 %v513_v49 }
 0x173   : > { %1480 = vmatmul.msk.f32.vlgmr.msra.gmra.mxu0 %vm557_vm4, %v2409_v27 }
 0x175   : > { %1264 = vrot.lane.b32.xlu2 %v1241_v55, %s1751_s5 }
 0x176   : > { %965 = vrot.lane.b32.xlu0 %v946_v18, %s1750_s30  ;;  %v2503_v18 = vld [vmem:[%s2898_s2 + $0x28] sm:$0xff] }
 0x177   : > { %917 = vrot.lane.b32.xlu1 %v900_v29, %s1749_s25  ;;  %v677_v0 = vpop.permute.xlu2 %676 }
 0x178   : > { %v2422_v22 = vpop.permute.xlu0 %554  ;;  %v2424_v15 = vpop.permute.xlu1 %544 }
 0x17b   : > { %1481 = vmatmul.msk.f32.gmra.mxu0 %vm557_vm4, %v2429_v40 }
 0x17d   : > { %963 = vrot.lane.b32.xlu2 %v945_v17, %s1750_s30 }
 0x17e   : > { %1059 = vrot.lane.b32.xlu0 %v2125_v44, %s1752_s29 }
 0x17f   : > { %1011 = vrot.lane.b32.xlu1 %v2059_v4, %s1751_s5  ;;  %v683_v3 = vpop.permute.xlu2 %682  ;;  %v1147_v4 = vmul.f32 %v2009_v52, %v1896_v11 }
 0x180   : > { %v673_v16 = vpop.permute.xlu0 %672  ;;  %v669_v7 = vpop.permute.xlu1 %668 }
 0x181   : > { %v684_v20 = vsel %vm369_vm0, %v669_v7, %v671_v50 }
 0x182   : > { %v692_v57 = vadd.f32 %v684_v20, %v648_v12  ;;  %v2523_v20 = vld [vmem:[%s2898_s2 + $0x30] sm:$0xff] }
 0x183   : > { %1482 = vmatmul.msk.f32.gmra.mxu0 %vm557_vm4, %v2445_v63 }
 0x185   : > { %1013 = vrot.lane.b32.xlu2 %v2062_v5, %s1751_s5  ;;  %v2467_v5 = vld [vmem:[%s1872_s14 + $0xc0] sm:$0xff] }
 0x186   : > { %1164 = vrot.lane.b32.xlu0 %v1147_v4, %s1749_s25  ;;  %v1146_v62 = vmul.f32 %v2467_v5, %v1896_v11  ;;  %v2486_v11 = vld [vmem:[%s2898_s2 + $0x20] sm:$0xff] }
 0x187   : > { %1061 = vrot.lane.b32.xlu1 %v2128_v45, %s1752_s29  ;;  %v717_v44 = vpop.permute.xlu2 %716 }
 0x188   : > { %v679_v9 = vpop.permute.xlu0 %678  ;;  %v675_v14 = vpop.permute.xlu1 %674 }
 0x189   : > { %v686_v36 = vsel %vm369_vm0, %v677_v0, %v679_v9  ;;  %v685_v45 = vsel %vm369_vm0, %v673_v16, %v675_v14  ;;  %v2952_v9 = vld [vmem:[#allocation10_spill] sm:$0xff] }
 0x18a   : > { %v694_v34 = vadd.f32 %v686_v36, %v650_v21  ;;  %v693_v37 = vadd.f32 %v685_v45, %v649_v31  ;;  %v944_v31 = vmul.f32 %v2005_v51, %v1918_v19  ;;  %v1145_v36 = vmul.f32 %v2114_v58, %v1940_v28 }
 0x18b   : > { %1483 = vmatmul.msk.f32.gmra.mxu0 %vm557_vm4, %v2464_v46 }
 0x18d   : > { %1162 = vrot.lane.b32.xlu2 %v1146_v62, %s1749_s25  ;;  %v2545_v62 = vld [vmem:[%s2898_s2 + $0x38] sm:$0xff] }
 0x18e   : > { %1258 = vrot.lane.b32.xlu0 %v2065_v6, %s1751_s5  ;;  %v1193_v6 = vmul.f32 %v2351_v33, %v1985_v43 }
 0x18f   : > { %1210 = vrot.lane.b32.xlu1 %v1192_v2, %s1750_s30  ;;  %v723_v42 = vpop.permute.xlu2 %722 }
 0x190   : > { %v713_v35 = vpop.permute.xlu0 %712  ;;  %v681_v54 = vpop.permute.xlu1 %680 }
 0x191   : > { %v687_v26 = vsel %vm369_vm0, %v681_v54, %v683_v3  ;;  %v2950_v3 = vld [vmem:[#allocation9_spill] sm:$0xff] }
 0x192   : > { %v2489_v50 = vadd.f32 %v687_v26, %v651_v41  ;;  %v2954_v26 = vld [vmem:[#allocation19_spill] sm:$0xff] }
 0x193   : > { %1484 = vmatmul.msk.f32.gmra.mxu0 %vm557_vm4, %v2486_v11 }
 0x195   : > { %1212 = vrot.lane.b32.xlu2 %v1193_v6, %s1750_s30  ;;  %v897_v6 = vmul.f32 %v2954_v26, %v1928_v23  ;;  %v2961_v26 = vld [vmem:[#allocation13_spill] sm:$0xff] }
 0x196   : > { %1308 = vrot.lane.b32.xlu0 %v2131_v47, %s1752_s29  ;;  %v2949_v47 = vld [vmem:[#allocation29_spill] sm:$0xff] }
 0x197   : > { %1260 = vrot.lane.b32.xlu1 %v2068_v8, %s1751_s5  ;;  %v1175_v30 = vpop.permute.xlu2 %1174  ;;  %v943_v8 = vmul.f32 %v2383_v59, %v1918_v19 }
 0x198   : > { %v719_v49 = vpop.permute.xlu0 %718  ;;  %v715_v55 = vpop.permute.xlu1 %714 }
 0x199   : > { %v729_v29 = vsel %vm414_vm1, %v717_v44, %v719_v49  ;;  %v728_v43 = vsel %vm414_vm1, %v713_v35, %v715_v55  ;;  %v2951_v44 = vld [vmem:[#allocation8_spill] sm:$0xff] }
 0x19a   : > { %v2507_v0 = vadd.f32 %v729_v29, %v693_v37  ;;  %v2509_v17 = vadd.f32 %v728_v43, %v692_v57  ;;  %v990_v21 = vmul.f32 %v2323_v24, %v2951_v44  ;;  %v989_v58 = vmul.f32 %v2311_v53, %v2951_v44  ;;  %v2955_v43 = vld [vmem:[#allocation23_spill] sm:$0xff] }
 0x19b   : > { %1485 = vmatmul.msk.f32.gmra.mxu0 %vm557_vm4, %v2503_v18  ;;  %v1237_v29 = vmul.f32 %v2351_v33, %v2951_v44 }
 0x19d   : > { %1306 = vrot.lane.b32.xlu2 %v2949_v47, %s1752_s29 }
 0x19e   : > { %959 = vrot.lane.b32.xlu0 %v943_v8, %s1750_s30  ;;  %v1191_v8 = vmul.f32 %v2009_v52, %v1918_v19  ;;  %v2956_v52 = vld [vmem:[#allocation11_spill] sm:$0xff] }
 0x19f   : > { %724 = vrot.lane.b32.xlu1 %v2950_v3, %s1750_s30  ;;  %v926_v16 = vpop.permute.xlu2 %925  ;;  %v1144_v3 = vmul.f32 %v2048_v1, %v1928_v23 }
 0x1a0   : > { %v928_v12 = vpop.permute.xlu0 %927  ;;  %v721_v7 = vpop.permute.xlu1 %720 }
 0x1a1   : > { %v730_v57 = vsel %vm414_vm1, %v721_v7, %v723_v42 }
 0x1a2   : > { %v2526_v4 = vadd.f32 %v730_v57, %v694_v34  ;;  %v898_v34 = vmul.f32 %v2111_v56, %v1940_v28  ;;  %v1190_v28 = vmul.f32 %v2467_v5, %v1918_v19  ;;  %v2953_v56 = vld [vmem:[#allocation22_spill] sm:$0xff]  ;;  %v1236_v19 = vmul.f32 %v2337_v32, %v2951_v44 }
 0x1a3   : > { %1486 = vmatmul.msk.f32.gmra.mxu0 %vm557_vm4, %v2523_v20 }
 0x1a5   : > { %726 = vrot.lane.b32.xlu2 %v2952_v9, %s1750_s30 }
 0x1a6   : > { %1009 = vrot.lane.b32.xlu0 %v990_v21, %s1751_s5 }
 0x1a7   : > { %961 = vrot.lane.b32.xlu1 %v944_v31, %s1750_s30  ;;  %v1171_v14 = vpop.permute.xlu2 %1170  ;;  %v2957_v31 = vld [vmem:[#allocation24_spill] sm:$0xff] }
 0x1a8   : > { %v1177_v45 = vpop.permute.xlu0 %1176  ;;  %v930_v37 = vpop.permute.xlu1 %929 }
 0x1a9   : > { %v1181_v51 = vsel %vm369_vm0, %v1175_v30, %v1177_v45  ;;  %v934_v2 = vsel %vm369_vm0, %v928_v12, %v930_v37  ;;  %v2959_v37 = vld [vmem:[#allocation14_spill] sm:$0xff] }
 0x1aa   : > { %v1189_v42 = vadd.f32 %v1181_v51, %v1145_v36  ;;  %v942_v35 = vadd.f32 %v934_v2, %v898_v34  ;;  %v2958_v34 = vld [vmem:[#allocation25_spill] sm:$0xff]  ;;  %v2960_v51 = vld [vmem:[#allocation12_spill] sm:$0xff] }
 0x1ab   : > { %1487 = vmatmul.msk.f32.gmra.mxu0 %vm557_vm4, %v2545_v62 }
 0x1ad   : > { %1007 = vrot.lane.b32.xlu2 %v989_v58, %s1751_s5  ;;  %v896_v58 = vmul.f32 %v2311_v53, %v2166_v60 }
 0x1ae   : > { %1206 = vrot.lane.b32.xlu0 %v1190_v28, %s1750_s30 }
 0x1af   : > { %1055 = vrot.lane.b32.xlu1 %v2953_v56, %s1752_s29  ;;  %v1221_v41 = vpop.permute.xlu2 %1220 }
 0x1b0   : > { %v972_v54 = vpop.permute.xlu0 %971  ;;  %v924_v30 = vpop.permute.xlu1 %923 }
 0x1b1   : > { %v933_v49 = vsel %vm369_vm0, %v924_v30, %v926_v16  ;;  %v1234_v30 = vmul.f32 %v2467_v5, %v2961_v26 }
 0x1b2   : > { %v941_v55 = vadd.f32 %v933_v49, %v897_v6  ;;  %v987_v6 = vmul.f32 %v2383_v59, %v2961_v26  ;;  %v2962_v49 = vld [vmem:[#allocation28_spill] sm:$0xff] }
 0x1b5   : > { %1057 = vrot.lane.b32.xlu2 %v2955_v43, %s1752_s29 }
 0x1b6   : > { %1256 = vrot.lane.b32.xlu0 %v1237_v29, %s1751_s5  ;;  %v1033_v29 = vmul.f32 %v2311_v53, %v2962_v49  ;;  %v2963_v53 = vld [vmem:[#allocation15_spill] sm:$0xff] }
 0x1b7   : > { %1208 = vrot.lane.b32.xlu1 %v1191_v8, %s1750_s30  ;;  %v968_v47 = vpop.permute.xlu2 %967  ;;  %s2664_s30 = scalar_lea.vmem [#allocation5], %s1478_s8  ;;  %s1569_s8 = sshll.u32 %s1801_s19, 8 }
 0x1b8   : > { %v1173_v12 = vpop.permute.xlu0 %1172  ;;  %v974_v16 = vpop.permute.xlu1 %973  ;;  %s1393_s6 = scalar_lea.hbm %s2900_s4, %s1569_s8  ;;  %s1394_s10 = sshll.u32 %s2664_s30, 4  ;;  %s1395_s10 = int_to_ptr.vmem [resolvable:$true] %s1394_s10 }
 0x1b9   : > { %v1180_v7 = vsel %vm369_vm0, %v1171_v14, %v1173_v12  ;;  %v978_v57 = vsel %vm414_vm1, %v972_v54, %v974_v16  ;;  %s1396_s9 = sshll.u32 %s1393_s6, 4  ;;  %s1397_s9 = int_to_ptr.hbm [resolvable:$true] %s1396_s9 }
 0x1ba   : > { %v1188_v21 = vadd.f32 %v1180_v7, %v1144_v3  ;;  %v2574_v9 = vadd.f32 %v978_v57, %v942_v35  ;;  %v1281_v3 = vmul.f32 %v2351_v33, %v2962_v49  ;;  %v1143_v7 = vmul.f32 %v2337_v32, %v2166_v60  ;;  %s1688_s14 = sshra.s32 %s1397_s9, 4  ;;  %s1689_s14 = int_to_ptr.hbm [resolvable:$true] %s1688_s14 }
 0x1bb   : > { %s1690_s19 = scalar_lea.hbm %s1689_s14, 256  ;;  %p1695_p0 = scmp.lt.s32.totalorder %s1689_s14, %s2900_s4 }
 0x1bc   : > { %p1691_p6 = scmp.ne.s32.totalorder %s1689_s14, %s1690_s19  ;;  %p1696_p1 = scmp.lt.s32.totalorder %s1694_s13, %s1690_s19 }
 0x1bd   : > { %1254 = vrot.lane.b32.xlu2 %v1236_v19, %s1751_s5 }
 0x1be   : > { %768 = vrot.lane.b32.xlu0 %v2956_v52, %s1751_s5  ;;  %p1692_p9 = pnand %p1691_p6, %p1830_p11  ;;  %p1697_p3 = por %p1696_p1, %p1695_p0 }
 0x1bf   : > { %1302 = vrot.lane.b32.xlu1 %v2957_v31, %s1752_s29  ;;  %v2583_v23 = vpop.permute.xlu2 %1017  ;;  %v1280_v31 = vmul.f32 %v2337_v32, %v2962_v49  ;;  %v2968_v32 = vld [vmem:[#allocation31_spill] sm:$0xff] }
 0x1c0   : > { %v920_v1 = vpop.permute.xlu0 %919  ;;  %v1219_v14 = vpop.permute.xlu1 %1218  ;;  %p1693_p13 = pneg %p1692_p9 }
 0x1c1   : > { %v1225_v36 = vsel %vm414_vm1, %v1219_v14, %v1221_v41  ;;  %v2965_v14 = vld [vmem:[#allocation20_spill] sm:$0xff] }
 0x1c2   : > { %v2586_v45 = vadd.f32 %v1225_v36, %v1189_v42  ;;  %p1698_p4 = pnand %p1697_p3, %p1693_p13 }
 0x1c5   : > { %1304 = vrot.lane.b32.xlu2 %v2958_v34, %s1752_s29 }
 0x1c6   : > { %1005 = vrot.lane.b32.xlu0 %v2959_v37, %s1751_s5  ;;  %v2967_v37 = vld [vmem:[#allocation17_spill] sm:$0xff] }
 0x1c7   : > { %770 = vrot.lane.b32.xlu1 %v2960_v51, %s1751_s5  ;;  %v1215_v2 = vpop.permute.xlu2 %1214 }
 0x1c8   : > { %v970_v35 = vpop.permute.xlu0 %969  ;;  %v922_v28 = vpop.permute.xlu1 %921 }
 0x1c9   : > { %v977_v56 = vsel %vm414_vm1, %v968_v47, %v970_v35  ;;  %v932_v42 = vsel %vm369_vm0, %v920_v1, %v922_v28  ;;  %v1034_v47 = vmul.f32 %v2323_v24, %v2962_v49  ;;  %v2964_v1 = vld [vmem:[#allocation30_spill] sm:$0xff] }
 0x1ca   : > { %v2598_v41 = vadd.f32 %v977_v56, %v941_v55  ;;  %v940_v54 = vadd.f32 %v932_v42, %v896_v58  ;;  %v895_v58 = vmul.f32 %v2383_v59, %v2155_v48 }
 0x1cd   : > { %1003 = vrot.lane.b32.xlu2 %v987_v6, %s1751_s5 }
 0x1ce   : > { %1250 = vrot.lane.b32.xlu0 %v1234_v30, %s1751_s5  ;;  %v2969_v30 = vld [vmem:[#allocation16_spill] sm:$0xff] }
 0x1cf   : > { %1051 = vrot.lane.b32.xlu1 %v1033_v29, %s1752_s29  ;;  %v2609_v43 = vpop.permute.xlu2 %1264  ;;  %v1031_v29 = vmul.f32 %v2383_v59, %v2969_v30 }
 0x1d0   : > { %v1167_v55 = vpop.permute.xlu0 %1166  ;;  %v1016_v8 = vpop.permute.xlu1 %1015 }
 0x1d5   : > { %1053 = vrot.lane.b32.xlu2 %v1034_v47, %s1752_s29  ;;  %v1278_v47 = vmul.f32 %v2467_v5, %v2969_v30 }
 0x1d6   : > { %1300 = vrot.lane.b32.xlu0 %v1281_v3, %s1752_s29 }
 0x1d7   : > { %1252 = vrot.lane.b32.xlu1 %v2963_v53, %s1751_s5  ;;  %v964_v12 = vpop.permute.xlu2 %963 }
 0x1d8   : > { %v1217_v16 = vpop.permute.xlu0 %1216  ;;  %v1169_v57 = vpop.permute.xlu1 %1168 }
 0x1d9   : > { %v1224_v19 = vsel %vm414_vm1, %v1215_v2, %v1217_v16  ;;  %v1179_v24 = vsel %vm369_vm0, %v1167_v55, %v1169_v57  ;;  %v742_v55 = vmul.f32 %v2196_v13, %v2951_v44  ;;  %v2971_v57 = vld [vmem:[#allocation33_spill] sm:$0xff] }
 0x1da   : > { %v2623_v52 = vadd.f32 %v1224_v19, %v1188_v21  ;;  %v2625_v33 = vadd.f32 %v1179_v24, %v1143_v7  ;;  %v2966_v21 = vld [vmem:[#allocation21_spill] sm:$0xff]  ;;  %v2970_v7 = vld [vmem:[#allocation18_spill] sm:$0xff]  ;;  %v743_v19 = vmul.f32 %v2971_v57, %v2951_v44  ;;  %v1022_v24 = vsel %vm459_vm2, %v1016_v8, %v2583_v23 }
 0x1dd   : > { %1298 = vrot.lane.b32.xlu2 %v1280_v31, %s1752_s29  ;;  %v2972_v31 = vld [vmem:[#allocation26_spill] sm:$0xff] }
 0x1de   : > { %812 = vrot.lane.b32.xlu0 %v2964_v1, %s1752_s29 }
 0x1df   : > { %764 = vrot.lane.b32.xlu1 %v2965_v14, %s1751_s5  ;;  %v2634_v60 = vpop.permute.xlu2 %1013  ;;  %v1142_v14 = vmul.f32 %v2467_v5, %v2155_v48  ;;  %v2974_v48 = vld [vmem:[#allocation27_spill] sm:$0xff]  ;;  %v740_v5 = vmul.f32 %v2199_v38, %v2961_v26 }
 0x1e0   : > { %v916_v36 = vpop.permute.xlu0 %915 }
 0x1e1   : > { %v1263_v34 = vpop.permute.xlu1 %1262 }
 0x1e5   : > { %766 = vrot.lane.b32.xlu2 %v2966_v21, %s1751_s5 }
 0x1e6   : > { %1049 = vrot.lane.b32.xlu0 %v2967_v37, %s1752_s29 }
 0x1e7   : > { %814 = vrot.lane.b32.xlu1 %v2968_v32, %s1752_s29  ;;  %v1163_v51 = vpop.permute.xlu2 %1162 }
 0x1e8   : > { %v966_v2 = vpop.permute.xlu0 %965 }
 0x1e9   : > { %v976_v35 = vsel %vm414_vm1, %v964_v12, %v966_v2  ;;  %v918_v28 = vpop.permute.xlu1 %917  ;;  %v2973_v2 = vld [vmem:[#allocation34_spill] sm:$0xff] }
 0x1ea   : > { %v2645_v56 = vadd.f32 %v976_v35, %v940_v54  ;;  %v931_v42 = vsel %vm369_vm0, %v916_v36, %v918_v28  ;;  %v1030_v35 = vadd.f32 %v1022_v24, %v2574_v9 }
 0x1eb   : > { %v2648_v6 = vadd.f32 %v931_v42, %v895_v58  ;;  %v786_v42 = vmul.f32 %v2196_v13, %v2962_v49 }
 0x1ed   : > { %1047 = vrot.lane.b32.xlu2 %v1031_v29, %s1752_s29 }
 0x1ee   : > { %760 = vrot.lane.b32.xlu0 %v742_v55, %s1751_s5 }
 0x1ef   : > { %1294 = vrot.lane.b32.xlu1 %v1278_v47, %s1752_s29  ;;  %v1213_v54 = vpop.permute.xlu2 %1212 }
 0x1f0   : > { %v1060_v3 = vpop.permute.xlu0 %1059  ;;  %v599_v53 = vpop.f32.mrf.mxu0 }
 0x1f1   : > { %v2659_v12 = vpop.permute.xlu1 %1011  ;;  %v600_v16 = vadd.f32 %v599_v53, %v2376_v39 }
 0x1f3   : > { %v623_v59 = vmax.f32 %v600_v16, 0.0  ;;  %v2975_v16 = vld [vmem:[#allocation32_spill] sm:$0xff] }
 0x1f5   : > { %631 = vst [vmem:[%s2664_s30] sm:$0xff] %v623_v59  ;;  %1296 = vrot.lane.b32.xlu2 %v2970_v7, %s1752_s29  ;;  %v741_v59 = vmul.f32 %v2975_v16, %v2961_v26  ;;  %v785_v7 = vmul.f32 %v2975_v16, %v2969_v30 }
 0x1f6   : > { %810 = vrot.lane.b32.xlu0 %v2972_v31, %s1752_s29 }
 0x1f7   : > { %762 = vrot.lane.b32.xlu1 %v743_v19, %s1751_s5  ;;  %v1307_v1 = vpop.permute.xlu2 %1306  ;;  %v1269_v19 = vsel %vm459_vm2, %v1263_v34, %v2609_v43 }
 0x1f8   : > { %v1165_v36 = vpop.permute.xlu0 %1164  ;;  %v602_v21 = vpop.f32.mrf.mxu0  ;;  %v1277_v31 = vadd.f32 %v1269_v19, %v2586_v45 }
 0x1f9   : > { %v1178_v37 = vsel %vm369_vm0, %v1163_v51, %v1165_v36  ;;  %v1062_v32 = vpop.permute.xlu1 %1061  ;;  %v603_v44 = vadd.f32 %v602_v21, %v2973_v2 }
 0x1fa   : > { %v2681_v23 = vadd.f32 %v1178_v37, %v1142_v14  ;;  %v1066_v8 = vsel %vm504_vm3, %v1060_v3, %v1062_v32 }
 0x1fb   : > { %v624_v58 = vmax.f32 %v603_v44, 0.0  ;;  %v1074_v28 = vadd.f32 %v1066_v8, %v1030_v35  ;;  %v2976_v44 = vld [vmem:[#allocation35_spill] sm:$0xff] }
 0x1fd   : > { %632 = vst [vmem:[%s2664_s30 + $0x8] sm:$0xff] %v624_v58  ;;  %1087 = vmatpush.msra.mxu2 %v1074_v28  ;;  %808 = vrot.lane.b32.xlu2 %v2974_v48, %s1752_s29 }
 0x1fe   : > { %804 = vrot.lane.b32.xlu0 %v786_v42, %s1752_s29 }
 0x1ff   : > { %756 = vrot.lane.b32.xlu1 %v740_v5, %s1751_s5  ;;  %v727_v9 = vpop.permute.xlu2 %726 }
 0x200   : > { %v2693_v51 = vpop.permute.xlu0 %1258  ;;  %v605_v29 = vpop.f32.mrf.mxu0 }
 0x201   : > { %v1211_v55 = vpop.permute.xlu1 %1210  ;;  %v606_v13 = vadd.f32 %v605_v29, %v2402_v10 }
 0x202   : > { %v1223_v47 = vsel %vm414_vm1, %v1211_v55, %v1213_v54  ;;  %v787_v54 = vmul.f32 %v2971_v57, %v2962_v49  ;;  %v784_v49 = vmul.f32 %v2199_v38, %v2969_v30 }
 0x203   : > { %v2698_v3 = vadd.f32 %v1223_v47, %v2625_v33  ;;  %v625_v53 = vmax.f32 %v606_v13, 0.0 }
 0x205   : > { %633 = vst [vmem:[%s2664_s30 + $0x10] sm:$0xff] %v625_v53  ;;  %758 = vrot.lane.b32.xlu2 %v741_v59, %s1751_s5 }
 0x206   : > { %802 = vrot.lane.b32.xlu0 %v785_v7, %s1752_s29 }
 0x207   : > { %806 = vrot.lane.b32.xlu1 %v787_v54, %s1752_s29  ;;  %v1008_v33 = vpop.permute.xlu2 %1007 }
 0x208   : > { %v1309_v24 = vpop.permute.xlu0 %1308  ;;  %v608_v26 = vpop.f32.mrf.mxu0 }
 0x209   : > { %v1261_v14 = vpop.permute.xlu1 %1260  ;;  %v609_v36 = vadd.f32 %v608_v26, %v2404_v25  ;;  %v1313_v43 = vsel %vm504_vm3, %v1307_v1, %v1309_v24 }
 0x20a   : > { %v1321_v34 = vadd.f32 %v1313_v43, %v1277_v31 }
 0x20b   : > { %v626_v21 = vmax.f32 %v609_v36, 0.0 }
 0x20c   : > { %1334 = vmatpush.msra.mxu3 %v1321_v34 }
 0x20d   : > { %634 = vst [vmem:[%s2664_s30 + $0x18] sm:$0xff] %v626_v21  ;;  %800 = vrot.lane.b32.xlu2 %v784_v49, %s1752_s29 }
 0x20f   : > { %v1058_v57 = vpop.permute.xlu2 %1057 }
 0x210   : > { %v960_v37 = vpop.permute.xlu0 %959  ;;  %v611_v32 = vpop.f32.mrf.mxu0 }
 0x211   : > { %v725_v45 = vpop.permute.xlu1 %724  ;;  %v612_v35 = vadd.f32 %v611_v32, %v2976_v44 }
 0x212   : > { %v731_v8 = vsel %vm414_vm1, %v725_v45, %v727_v9 }
 0x213   : > { %v2722_v1 = vadd.f32 %v731_v8, %v2489_v50  ;;  %v627_v58 = vmax.f32 %v612_v35, 0.0  ;;  %v1021_v50 = vsel %vm459_vm2, %v2659_v12, %v2634_v60 }
 0x214   : > { %v1029_v53 = vadd.f32 %v1021_v50, %v2598_v41  ;;  %v1268_v41 = vsel %vm459_vm2, %v2693_v51, %v1261_v14 }
 0x215   : > { %635 = vst [vmem:[%s2664_s30 + $0x20] sm:$0xff] %v627_v58  ;;  %v1276_v43 = vadd.f32 %v1268_v41, %v2623_v52 }
 0x217   : > { %v1255_v28 = vpop.permute.xlu2 %1254 }
 0x218   : > { %v1010_v38 = vpop.permute.xlu0 %1009  ;;  %v614_v30 = vpop.f32.mrf.mxu0 }
 0x219   : > { %v962_v42 = vpop.permute.xlu1 %961  ;;  %v615_v48 = vadd.f32 %v614_v30, %v2424_v15  ;;  %v1020_v35 = vsel %vm459_vm2, %v1008_v33, %v1010_v38 }
 0x21a   : > { %v975_v5 = vsel %vm414_vm1, %v960_v37, %v962_v42  ;;  %v1028_v58 = vadd.f32 %v1020_v35, %v2645_v56 }
 0x21b   : > { %v983_v29 = vadd.f32 %v975_v5, %v2648_v6  ;;  %v628_v55 = vmax.f32 %v615_v48, 0.0 }
 0x21d   : > { %636 = vst [vmem:[%s2664_s30 + $0x28] sm:$0xff] %v628_v55 }
 0x21f   : > { %v1305_v9 = vpop.permute.xlu2 %1304 }
 0x220   : > { %v1207_v13 = vpop.permute.xlu0 %1206  ;;  %v617_v47 = vpop.f32.mrf.mxu0 }
 0x221   : > { %v1056_v16 = vpop.permute.xlu1 %1055  ;;  %v618_v59 = vadd.f32 %v617_v47, %v2373_v61 }
 0x222   : > { %v1065_v7 = vsel %vm504_vm3, %v1056_v16, %v1058_v57 }
 0x223   : > { %v629_v19 = vmax.f32 %v618_v59, 0.0  ;;  %v1073_v54 = vadd.f32 %v1065_v7, %v1029_v53 }
 0x225   : > { %637 = vst [vmem:[%s2664_s30 + $0x30] sm:$0xff] %v629_v19  ;;  %1088 = vmatpush.msra.mxu2 %v1073_v54 }
 0x227   : > { %v1004_v26 = vpop.permute.xlu2 %1003 }
 0x228   : > { %v1257_v6 = vpop.permute.xlu0 %1256  ;;  %v620_v24 = vpop.f32.mrf.mxu0 }
 0x229   : > { %v1209_v31 = vpop.permute.xlu1 %1208  ;;  %v621_v60 = vadd.f32 %v620_v24, %v2422_v22  ;;  %v1267_v52 = vsel %vm459_vm2, %v1255_v28, %v1257_v6 }
 0x22a   : > { %v1275_v48 = vadd.f32 %v1267_v52, %v2698_v3 }
 0x22b   : > { %v630_v12 = vmax.f32 %v621_v60, 0.0  ;;  %v1222_v60 = vsel %vm414_vm1, %v1207_v13, %v1209_v31 }
 0x22d   : > { %638 = vst [vmem:[%s2664_s30 + $0x38] sm:$0xff] %v630_v12 }
 0x22f   : > { %v1054_v49 = vpop.permute.xlu2 %1053 }
 0x230   : > { %v769_v36 = vpop.permute.xlu0 %768 }
 0x231   : > { %v1303_v34 = vpop.permute.xlu1 %1302 }
 0x232   : > { %v1312_v21 = vsel %vm504_vm3, %v1303_v34, %v1305_v9 }
 0x233   : > { %v1320_v57 = vadd.f32 %v1312_v21, %v1276_v43 }
 0x235   : > { %1335 = vmatpush.msra.mxu3 %v1320_v57 }
 0x237   : > { %v1299_v45 = vpop.permute.xlu2 %1298 }
 0x238   : > { %v1006_v37 = vpop.permute.xlu0 %1005 }
 0x239   : > { %v771_v32 = vpop.permute.xlu1 %770  ;;  %v1019_v56 = vsel %vm459_vm2, %v1004_v26, %v1006_v37  ;;  %v1230_v26 = vadd.f32 %v1222_v60, %v2681_v23 }
 0x23a   : > { %v775_v53 = vsel %vm459_vm2, %v769_v36, %v771_v32  ;;  %v1027_v16 = vadd.f32 %v1019_v56, %v983_v29 }
 0x23b   : > { %v783_v3 = vadd.f32 %v775_v53, %v2722_v1 }
 0x23f   : > { %v767_v42 = vpop.permute.xlu2 %766 }
 0x240   : > { %v1251_v8 = vpop.permute.xlu0 %1250 }
 0x241   : > { %v1052_v30 = vpop.permute.xlu1 %1051 }
 0x242   : > { %v1064_v51 = vsel %vm504_vm3, %v1052_v30, %v1054_v49 }
 0x243   : > { %v1072_v14 = vadd.f32 %v1064_v51, %v1028_v58 }
 0x245   : > { %1089 = vmatpush.msra.mxu2 %v1072_v14 }
 0x247   : > { %v1048_v38 = vpop.permute.xlu2 %1047 }
 0x248   : > { %v1301_v5 = vpop.permute.xlu0 %1300 }
 0x249   : > { %v1311_v55 = vsel %vm504_vm3, %v1299_v45, %v1301_v5  ;;  %v1253_v50 = vpop.permute.xlu1 %1252 }
 0x24a   : > { %v1319_v9 = vadd.f32 %v1311_v55, %v1275_v48  ;;  %v1266_v29 = vsel %vm459_vm2, %v1251_v8, %v1253_v50 }
 0x24b   : > { %v1274_v41 = vadd.f32 %v1266_v29, %v1230_v26 }
 0x24c   : > { %1336 = vmatpush.msra.mxu3 %v1319_v9 }
 0x24f   : > { %v1297_v6 = vpop.permute.xlu2 %1296 }
 0x250   : > { %v813_v33 = vpop.permute.xlu0 %812 }
 0x251   : > { %v765_v47 = vpop.permute.xlu1 %764 }
 0x252   : > { %v774_v34 = vsel %vm459_vm2, %v765_v47, %v767_v42 }
 0x253   : > { %v782_v13 = vadd.f32 %v774_v34, %v2526_v4 }
 0x257   : > { %v809_v21 = vpop.permute.xlu2 %808 }
 0x258   : > { %v1050_v59 = vpop.permute.xlu0 %1049 }
 0x259   : > { %v1063_v28 = vsel %vm504_vm3, %v1048_v38, %v1050_v59  ;;  %v815_v7 = vpop.permute.xlu1 %814 }
 0x25a   : > { %v819_v19 = vsel %vm504_vm3, %v813_v33, %v815_v7  ;;  %v1071_v54 = vadd.f32 %v1063_v28, %v1027_v16 }
 0x25b   : > { %v827_v24 = vadd.f32 %v819_v19, %v783_v3 }
 0x25c   : > { %1090 = vmatpush.msra.mxu2 %v1071_v54 }
 0x25d   : > { %840 = vmatpush.msra.mxu1 %v827_v24  ;;  %1520 = vmatmul.msk.f32.vlgmr.msra.gmra.mxu2 %vm557_vm4, %v2409_v27 }
 0x25f   : > { %v759_v37 = vpop.permute.xlu2 %758 }
 0x260   : > { %v761_v12 = vpop.permute.xlu0 %760 }
 0x261   : > { %v1295_v36 = vpop.permute.xlu1 %1294 }
 0x262   : > { %v1310_v1 = vsel %vm504_vm3, %v1295_v36, %v1297_v6 }
 0x263   : > { %v1318_v43 = vadd.f32 %v1310_v1, %v1274_v41 }
 0x265   : > { %1337 = vmatpush.msra.mxu3 %v1318_v43  ;;  %1521 = vmatmul.msk.f32.gmra.mxu2 %vm557_vm4, %v2429_v40 }
 0x266   : > { %1544 = vmatmul.msk.f32.vlgmr.msra.gmra.mxu3 %vm557_vm4, %v2409_v27 }
 0x267   : > { %v801_v58 = vpop.permute.xlu2 %800 }
 0x268   : > { %v811_v31 = vpop.permute.xlu0 %810 }
 0x269   : > { %v818_v23 = vsel %vm504_vm3, %v809_v21, %v811_v31  ;;  %v763_v49 = vpop.permute.xlu1 %762 }
 0x26a   : > { %v826_v57 = vadd.f32 %v818_v23, %v782_v13  ;;  %v773_v4 = vsel %vm459_vm2, %v761_v12, %v763_v49 }
 0x26b   : > { %v781_v30 = vadd.f32 %v773_v4, %v2507_v0 }
 0x26c   : > { %841 = vmatpush.msra.mxu1 %v826_v57 }
 0x26d   : > { %1522 = vmatmul.msk.f32.gmra.mxu2 %vm557_vm4, %v2445_v63 }
 0x26e   : > { %1545 = vmatmul.msk.f32.gmra.mxu3 %vm557_vm4, %v2429_v40 }
 0x270   : > { %v805_v32 = vpop.permute.xlu0 %804 }
 0x271   : > { %v757_v45 = vpop.permute.xlu1 %756 }
 0x272   : > { %v772_v35 = vsel %vm459_vm2, %v757_v45, %v759_v37 }
 0x273   : > { %v780_v42 = vadd.f32 %v772_v35, %v2509_v17 }
 0x275   : > { %1523 = vmatmul.msk.f32.gmra.mxu2 %vm557_vm4, %v2464_v46 }
 0x276   : > { %1546 = vmatmul.msk.f32.gmra.mxu3 %vm557_vm4, %v2445_v63 }
 0x278   : > { %v803_v8 = vpop.permute.xlu0 %802 }
 0x279   : > { %v807_v51 = vpop.permute.xlu1 %806  ;;  %v816_v14 = vsel %vm504_vm3, %v801_v58, %v803_v8 }
 0x27a   : > { %v817_v52 = vsel %vm504_vm3, %v805_v32, %v807_v51  ;;  %v824_v5 = vadd.f32 %v816_v14, %v780_v42 }
 0x27b   : > { %v825_v48 = vadd.f32 %v817_v52, %v781_v30 }
 0x27d   : > { %842 = vmatpush.msra.mxu1 %v825_v48  ;;  %1524 = vmatmul.msk.f32.gmra.mxu2 %vm557_vm4, %v2486_v11 }
 0x27e   : > { %1547 = vmatmul.msk.f32.gmra.mxu3 %vm557_vm4, %v2464_v46 }
 0x27f   : > { %843 = vmatpush.msra.mxu1 %v824_v5 }
 0x280   : > { %1496 = vmatmul.msk.f32.vlgmr.msra.gmra.mxu1 %vm557_vm4, %v2409_v27 }
 0x285   : > { %1525 = vmatmul.msk.f32.gmra.mxu2 %vm557_vm4, %v2503_v18 }
 0x286   : > { %1548 = vmatmul.msk.f32.gmra.mxu3 %vm557_vm4, %v2486_v11 }
 0x288   : > { %1497 = vmatmul.msk.f32.gmra.mxu1 %vm557_vm4, %v2429_v40 }
 0x28d   : > { %1526 = vmatmul.msk.f32.gmra.mxu2 %vm557_vm4, %v2523_v20 }
 0x28e   : > { %1549 = vmatmul.msk.f32.gmra.mxu3 %vm557_vm4, %v2503_v18 }
 0x290   : > { %1498 = vmatmul.msk.f32.gmra.mxu1 %vm557_vm4, %v2445_v63 }
 0x295   : > { %1527 = vmatmul.msk.f32.gmra.mxu2 %vm557_vm4, %v2545_v62 }
 0x296   : > { %1550 = vmatmul.msk.f32.gmra.mxu3 %vm557_vm4, %v2523_v20 }
 0x298   : > { %1499 = vmatmul.msk.f32.gmra.mxu1 %vm557_vm4, %v2464_v46 }
 0x29e   : > { %1551 = vmatmul.msk.f32.gmra.mxu3 %vm557_vm4, %v2545_v62 }
 0x2a0   : > { %1500 = vmatmul.msk.f32.gmra.mxu1 %vm557_vm4, %v2486_v11 }
 0x2a8   : > { %1501 = vmatmul.msk.f32.gmra.mxu1 %vm557_vm4, %v2503_v18 }
 0x2b0   : > { %1502 = vmatmul.msk.f32.gmra.mxu1 %vm557_vm4, %v2523_v20 }
 0x2b8   : > { %1503 = vmatmul.msk.f32.gmra.mxu1 %vm557_vm4, %v2545_v62 }
 0x2e0   : > { %v1092_v27 = vpop.f32.mrf.mxu2 }
 0x2e1   : > { %v1093_v40 = vadd.f32 %v1092_v27, %v2376_v39 }
 0x2e3   : > { %v1116_v63 = vmax.f32 %v1093_v40, 0.0 }
 0x2e5   : > { %1528 = vst [vmem:[%s2664_s30 + $0x80] sm:$0xff] %v1116_v63 }
 0x2e8   : > { %v1095_v46 = vpop.f32.mrf.mxu2 }
 0x2e9   : > { %v1096_v0 = vadd.f32 %v1095_v46, %v2973_v2  ;;  %v1339_v11 = vpop.f32.mrf.mxu3 }
 0x2ea   : > { %v1340_v17 = vadd.f32 %v1339_v11, %v2376_v39 }
 0x2eb   : > { %v1117_v18 = vmax.f32 %v1096_v0, 0.0 }
 0x2ec   : > { %v1363_v55 = vmax.f32 %v1340_v17, 0.0 }
 0x2ed   : > { %1529 = vst [vmem:[%s2664_s30 + $0x88] sm:$0xff] %v1117_v18 }
 0x2ee   : > { %1552 = vst [vmem:[%s2664_s30 + $0xc0] sm:$0xff] %v1363_v55 }
 0x2f0   : > { %v1098_v20 = vpop.f32.mrf.mxu2 }
 0x2f1   : > { %v1099_v62 = vadd.f32 %v1098_v20, %v2402_v10  ;;  %v1342_v50 = vpop.f32.mrf.mxu3 }
 0x2f2   : > { %v1343_v9 = vadd.f32 %v1342_v50, %v2973_v2 }
 0x2f3   : > { %v1118_v33 = vmax.f32 %v1099_v62, 0.0 }
 0x2f4   : > { %v1364_v38 = vmax.f32 %v1343_v9, 0.0 }
 0x2f5   : > { %1530 = vst [vmem:[%s2664_s30 + $0x90] sm:$0xff] %v1118_v33 }
 0x2f6   : > { %1553 = vst [vmem:[%s2664_s30 + $0xc8] sm:$0xff] %v1364_v38 }
 0x2f8   : > { %v1101_v47 = vpop.f32.mrf.mxu2 }
 0x2f9   : > { %v1102_v56 = vadd.f32 %v1101_v47, %v2404_v25  ;;  %v1345_v53 = vpop.f32.mrf.mxu3 }
 0x2fa   : > { %v1346_v16 = vadd.f32 %v1345_v53, %v2402_v10 }
 0x2fb   : > { %v1119_v59 = vmax.f32 %v1102_v56, 0.0 }
 0x2fc   : > { %v1365_v28 = vmax.f32 %v1346_v16, 0.0 }
 0x2fd   : > { %1531 = vst [vmem:[%s2664_s30 + $0x98] sm:$0xff] %v1119_v59  ;;  %v845_v7 = vpop.f32.mrf.mxu1 }
 0x2fe   : > { %1554 = vst [vmem:[%s2664_s30 + $0xd0] sm:$0xff] %v1365_v28  ;;  %v846_v3 = vadd.f32 %v845_v7, %v2376_v39 }
 0x300   : > { %v869_v19 = vmax.f32 %v846_v3, 0.0  ;;  %v1104_v54 = vpop.f32.mrf.mxu2 }
 0x301   : > { %v1105_v6 = vadd.f32 %v1104_v54, %v2976_v44  ;;  %v1348_v24 = vpop.f32.mrf.mxu3 }
 0x302   : > { %1504 = vst [vmem:[%s2664_s30 + $0x40] sm:$0xff] %v869_v19  ;;  %v1349_v60 = vadd.f32 %v1348_v24, %v2404_v25 }
 0x303   : > { %v1120_v29 = vmax.f32 %v1105_v6, 0.0 }
 0x304   : > { %v1366_v26 = vmax.f32 %v1349_v60, 0.0 }
 0x305   : > { %1532 = vst [vmem:[%s2664_s30 + $0xa0] sm:$0xff] %v1120_v29  ;;  %v848_v12 = vpop.f32.mrf.mxu1 }
 0x306   : > { %1555 = vst [vmem:[%s2664_s30 + $0xd8] sm:$0xff] %v1366_v26  ;;  %v849_v41 = vadd.f32 %v848_v12, %v2973_v2 }
 0x308   : > { %v870_v36 = vmax.f32 %v849_v41, 0.0  ;;  %v1107_v39 = vpop.f32.mrf.mxu2 }
 0x309   : > { %v1108_v1 = vadd.f32 %v1107_v39, %v2424_v15  ;;  %v1351_v43 = vpop.f32.mrf.mxu3 }
 0x30a   : > { %1505 = vst [vmem:[%s2664_s30 + $0x48] sm:$0xff] %v870_v36  ;;  %v1352_v34 = vadd.f32 %v1351_v43, %v2976_v44 }
 0x30b   : > { %v1121_v21 = vmax.f32 %v1108_v1, 0.0 }
 0x30c   : > { %v1367_v13 = vmax.f32 %v1352_v34, 0.0 }
 0x30d   : > { %1533 = vst [vmem:[%s2664_s30 + $0xa8] sm:$0xff] %v1121_v21  ;;  %v851_v31 = vpop.f32.mrf.mxu1 }
 0x30e   : > { %1556 = vst [vmem:[%s2664_s30 + $0xe0] sm:$0xff] %v1367_v13  ;;  %v852_v23 = vadd.f32 %v851_v31, %v2402_v10 }
 0x310   : > { %v871_v49 = vmax.f32 %v852_v23, 0.0  ;;  %v1110_v2 = vpop.f32.mrf.mxu2 }
 0x311   : > { %v1111_v57 = vadd.f32 %v1110_v2, %v2373_v61  ;;  %v1354_v37 = vpop.f32.mrf.mxu3 }
 0x312   : > { %1506 = vst [vmem:[%s2664_s30 + $0x50] sm:$0xff] %v871_v49  ;;  %v1355_v32 = vadd.f32 %v1354_v37, %v2424_v15 }
 0x313   : > { %v1122_v45 = vmax.f32 %v1111_v57, 0.0 }
 0x314   : > { %v1368_v4 = vmax.f32 %v1355_v32, 0.0 }
 0x315   : > { %1534 = vst [vmem:[%s2664_s30 + $0xb0] sm:$0xff] %v1122_v45  ;;  %v854_v35 = vpop.f32.mrf.mxu1 }
 0x316   : > { %1557 = vst [vmem:[%s2664_s30 + $0xe8] sm:$0xff] %v1368_v4  ;;  %v855_v8 = vadd.f32 %v854_v35, %v2404_v25 }
 0x318   : > { %v872_v10 = vmax.f32 %v855_v8, 0.0  ;;  %v1113_v58 = vpop.f32.mrf.mxu2 }
 0x319   : > { %v1114_v30 = vadd.f32 %v1113_v58, %v2422_v22  ;;  %v1357_v51 = vpop.f32.mrf.mxu3 }
 0x31a   : > { %1507 = vst [vmem:[%s2664_s30 + $0x58] sm:$0xff] %v872_v10  ;;  %v1358_v14 = vadd.f32 %v1357_v51, %v2373_v61 }
 0x31b   : > { %v1123_v52 = vmax.f32 %v1114_v30, 0.0 }
 0x31c   : > { %v1369_v42 = vmax.f32 %v1358_v14, 0.0 }
 0x31d   : > { %1535 = vst [vmem:[%s2664_s30 + $0xb8] sm:$0xff] %v1123_v52  ;;  %v857_v48 = vpop.f32.mrf.mxu1 }
 0x31e   : > { %1558 = vst [vmem:[%s2664_s30 + $0xf0] sm:$0xff] %v1369_v42  ;;  %v858_v5 = vadd.f32 %v857_v48, %v2976_v44 }
 0x320   : > { %v873_v25 = vmax.f32 %v858_v5, 0.0 }
 0x321   : > { %v1360_v27 = vpop.f32.mrf.mxu3 }
 0x322   : > { %1508 = vst [vmem:[%s2664_s30 + $0x60] sm:$0xff] %v873_v25  ;;  %v1361_v40 = vadd.f32 %v1360_v27, %v2422_v22 }
 0x324   : > { %v1370_v63 = vmax.f32 %v1361_v40, 0.0 }
 0x325   : > { %v860_v46 = vpop.f32.mrf.mxu1 }
 0x326   : > { %1559 = vst [vmem:[%s2664_s30 + $0xf8] sm:$0xff] %v1370_v63  ;;  %v861_v0 = vadd.f32 %v860_v46, %v2424_v15 }
 0x328   : > { %v874_v11 = vmax.f32 %v861_v0, 0.0 }
 0x32a   : > { %1509 = vst [vmem:[%s2664_s30 + $0x68] sm:$0xff] %v874_v11 }
 0x32d   : > { %v863_v17 = vpop.f32.mrf.mxu1 }
 0x32e   : > { %v864_v18 = vadd.f32 %v863_v17, %v2373_v61 }
 0x330   : > { %v875_v44 = vmax.f32 %v864_v18, 0.0 }
 0x332   : > { %1510 = vst [vmem:[%s2664_s30 + $0x70] sm:$0xff] %v875_v44 }
 0x335   : > { %v866_v55 = vpop.f32.mrf.mxu1 }
 0x336   : > { %v867_v15 = vadd.f32 %v866_v55, %v2422_v22 }
 0x338   : > { %v876_v20 = vmax.f32 %v867_v15, 0.0 }
 0x33a   : > { %1511 = vst [vmem:[%s2664_s30 + $0x78] sm:$0xff] %v876_v20 }
 0x33b   : > { %1701 = shalt.err (!%p1698_p4)
}
 0x33c   : > { %s1753_s7 = smov 128   ;;  %s1754_s26 = smov 8  }
 0x33d   : > { %1572 = dma.vmem_to_hbm [thread:$0]  (%p1830_p11), %s1395_s10, 4096, %s1397_s9, %s1381_s11, %s1753_s7, %s1753_s7, %s1754_s26  }
 0x33e PF: > { %s1411_s23 = sand.u32 1, %s1728_s15   ;;  %p2977_p7 = scmp.ge.s32.totalorder %s1740_s18, 2 }
 0x33f   : > { %s1412_s30 = scalar_lea.sflag [#allocation4], %s1411_s23 }
 0x340   : > { %p1579_p5 = pnand %p2977_p7, %p1834_p12 }
 0x342   : > { %p1580_p8 = pneg %p1579_p5 }
 0x344   : > { %1723 = dma.done.wait (%p1580_p8), %s1412_s30, 4096  }
 0x345   : > { %1725 = vsyncadd (%p1580_p8), %s1412_s30, 4294963200  ;;  %p17_p10 = scmp.ge.s32.totalorder %s1805_s21, 4   ;;  %s2978_s15 = smov %s1732_s16 }
 0x346   : > { %s2979_s16 = smov %s1736_s17  ;;  %s2980_s17 = smov %s1817_s24 }
 0x347   : > { %s2981_s18 = smov %s1805_s21  ;;  %19 = sbr.rel (!%p17_p10) target bundleno = 5 (0x5), region = 87 }
 0x34c   :  { %1418 = vsyncpa [#allocation3], 1 }
 0x34d   :  { %1420 = vsyncpa [#allocation3 + $0x1], 1 }
 0x34e   :  { %1421 = vsyncpa [#allocation4], 1 }
 0x34f   :  { %1423 = vsyncpa [#allocation4 + $0x1], 1 }

</bundles_post_ra>
